<compile_context>
chip_gen: v7x
topology: tpu7x:2x2x1
jax: 0.10.0
libtpu: 0.0.40
codegen_flags: <defaults>
</compile_context>

<pallas_src>
import numpy as np
import jax
import jax.numpy as jnp
from jax.experimental import pallas as pl
from jax.experimental.pallas import tpu as pltpu

X_SIZE = 32
H_SIZE = 32
NUM_VOCABS = 50
NUM_CLASSES = 1          # module computes BCEWithLogitsLoss on logits.view(1) => 1 class
DEPTH = 3                # complete binary tree: 7 nodes, node 0 = root, children(i) = (2i+1, 2i+2)
N_NODES = 2 ** DEPTH - 1
N_LEAVES = 2 ** (DEPTH - 1)
LEAF_POS = 2 ** (DEPTH - 1) - 1        # first leaf storage position

GATE = 128               # one 128-lane block per gate
VOCAB_PAD = 128          # vocab padded to one lane block for the one-hot gather
N_POS = 8                # node-state rows (7 nodes + 1 pad row, sublane aligned)


def _storage_layout():
    """Storage order keeping every frontier's left/right children contiguous:
    level L is stored as [left children of level L-1 (in storage order), right children]."""
    levels = [[0]]
    for _ in range(DEPTH - 1):
        prev = levels[-1]
        levels.append([2 * p + 1 for p in prev] + [2 * p + 2 for p in prev])
    frontiers = []       # (lpos, rpos, ppos, m), bottom-up, all compile-time constants
    for lvl in range(DEPTH - 1, 0, -1):
        m = 2 ** (lvl - 1)
        lpos = 2 ** lvl - 1
        frontiers.append((lpos, lpos + m, 2 ** (lvl - 1) - 1, m))
    return levels[-1], frontiers


LEAF_NODE_ORDER, _FRONTIERS = _storage_layout()     # [3,5,4,6] ; [(3,5,1,2),(1,2,0,1)]


# --------------------------------------------------------------------------- fused kernel
def _tree_lstm_kernel(tok_ref, label_ref, c0_ref,                 # per-tree VMEM inputs
                      tab_ref, wtop_ref, wbot_ref, bfused_ref,    # resident weights (VMEM)
                      linw_ref, linb_ref,
                      out_ref,                                    # (1,1,128) lane-dense output
                      h_st, c_st):                                # VMEM node-state scratch
    f32 = jnp.float32
    G = GATE

    # ---- leaves: exact one-hot gather of the host-precomputed (emb@W_iou + b_iou) table ----
    tok = tok_ref[0]                                              # (N_LEAVES, 1) int32, storage order
    onehot = (jax.lax.broadcasted_iota(jnp.int32, (N_LEAVES, VOCAB_PAD), 1)
              == tok).astype(f32)                                 # (4, 128)
    iou = jnp.dot(onehot, tab_ref[...], preferred_element_type=f32)   # (4, 3*G) gate-aligned
    sg = jax.nn.sigmoid(iou[:, :2 * G])                           # one EUP call over [i|o]
    i, o = sg[:, 0:G], sg[:, G:2 * G]
    u = jnp.tanh(iou[:, 2 * G:3 * G])
    c_leaf = i * u + c0_ref[0]                                    # (4,128); padded lanes stay 0
    h_leaf = o * jnp.tanh(c_leaf)
    h_st[LEAF_POS:LEAF_POS + N_LEAVES, :] = h_leaf
    c_st[LEAF_POS:LEAF_POS + N_LEAVES, :] = c_leaf

    # ---- internal frontiers, bottom-up: split left/right matmuls, contiguous state rows ----
    def frontier(lpos, rpos, ppos, m):
        hl = h_st[lpos:lpos + m, :]                               # (m,128) left-child h rows
        hr = h_st[rpos:rpos + m, :]                               # (m,128) right-child h rows
        fused = (jnp.dot(hl, wtop_ref[...], preferred_element_type=f32)
                 + jnp.dot(hr, wbot_ref[...], preferred_element_type=f32)
                 + bfused_ref[...])                               # (m, 5*G): [f_l|f_r|i|o|u]
        sg = jax.nn.sigmoid(fused[:, :4 * G])                     # one EUP call over [f_l|f_r|i|o]
        f_l, f_r = sg[:, 0:G], sg[:, G:2 * G]
        ig, og = sg[:, 2 * G:3 * G], sg[:, 3 * G:4 * G]
        ug = jnp.tanh(fused[:, 4 * G:5 * G])
        c_red = f_l * c_st[lpos:lpos + m, :] + f_r * c_st[rpos:rpos + m, :]
        cc = ig * ug + c_red
        hh = og * jnp.tanh(cc)
        h_st[ppos:ppos + m, :] = hh
        c_st[ppos:ppos + m, :] = cc

    for lpos, rpos, ppos, m in _FRONTIERS:
        frontier(lpos, rpos, ppos, m)

    # ---- root head + sigmoid + BCEWithLogits, packed lane-dense into one (1,128) row ----
    h_root = h_st[0:1, :]                                         # (1,128), padded lanes 0
    logits = jnp.sum(h_root * linw_ref[...], axis=-1, keepdims=True) + linb_ref[...]   # (1,1)
    prob = jax.nn.sigmoid(logits)
    y = label_ref[0]                                              # (1,1)
    loss = (jnp.maximum(logits, 0.0) - logits * y
            + jnp.log1p(jnp.exp(-jnp.abs(logits))))               # stable BCEWithLogits (mean of 1)
    lane = jax.lax.broadcasted_iota(jnp.int32, (1, GATE), 1)
    out_ref[0] = jnp.where(lane == 0, prob, jnp.where(lane == 1, loss, 0.0))


# ------------------------------------------------------------------------- param packing
def _gate_align(w, n_gates):
    """(rows, n_gates*H) -> (rows, n_gates*GATE) with each H-wide gate in its own 128-lane block."""
    rows = w.shape[0]
    out = jnp.zeros((rows, n_gates * GATE), jnp.float32)
    for g in range(n_gates):
        out = out.at[:, g * GATE:g * GATE + H_SIZE].set(w[:, g * H_SIZE:(g + 1) * H_SIZE])
    return out


def pack_params(params):
    """One-time host-side repack (f32, HIGHEST precision) into kernel-friendly layouts."""
    hp = jax.lax.Precision.HIGHEST
    H = H_SIZE
    # Leaf table: embedding folded through W_iou and b_iou -> (V, 3H), gate-aligned & vocab-padded.
    leaf = jnp.dot(params['emb'], params['W_iou_t'], precision=hp) + params['b_iou']     # (V, 3H)
    tab = jnp.zeros((VOCAB_PAD, 3 * GATE), jnp.float32).at[:NUM_VOCABS, :].set(_gate_align(leaf, 3))
    # Fused internal weight [U_f | U_iou] -> (2H, 5H), gate-aligned, split into left/right rows.
    w_all = _gate_align(jnp.concatenate([params['U_f_t'], params['U_iou_t']], axis=1), 5)  # (2H, 5G)
    w_top = jnp.zeros((GATE, 5 * GATE), jnp.float32).at[:H, :].set(w_all[:H, :])           # left child
    w_bot = jnp.zeros((GATE, 5 * GATE), jnp.float32).at[:H, :].set(w_all[H:, :])           # right child
    b_all = _gate_align(jnp.concatenate([params['U_f_b'], params['b_iou']], axis=1), 5)    # (1, 5G)
    lin_w = jnp.zeros((1, GATE), jnp.float32).at[:, :H].set(params['lin_w_t'].T)           # (1,128)
    lin_b = params['lin_b'].reshape(1, 1).astype(jnp.float32)
    return {'leaf_tab': tab, 'W_top': w_top, 'W_bot': w_bot, 'b_fused': b_all,
            'lin_w': lin_w, 'lin_b': lin_b}


# ------------------------------------------------------------------------------ forward
def _make_call(batch):
    return pl.pallas_call(
        _tree_lstm_kernel,
        out_shape=jax.ShapeDtypeStruct((batch, 1, GATE), jnp.float32),
        grid=(batch,),
        in_specs=[
            pl.BlockSpec((1, N_LEAVES, 1), lambda b: (b, 0, 0)),          # leaf tokens (storage order)
            pl.BlockSpec((1, 1, 1), lambda b: (b, 0, 0)),                 # label
            pl.BlockSpec((1, N_LEAVES, GATE), lambda b: (b, 0, 0)),       # leaf c0 (lane padded)
            pl.BlockSpec((VOCAB_PAD, 3 * GATE), lambda b: (0, 0)),        # leaf iou table
            pl.BlockSpec((GATE, 5 * GATE), lambda b: (0, 0)),             # W_top
            pl.BlockSpec((GATE, 5 * GATE), lambda b: (0, 0)),             # W_bot
            pl.BlockSpec((1, 5 * GATE), lambda b: (0, 0)),                # b_fused
            pl.BlockSpec((1, GATE), lambda b: (0, 0)),                    # lin_w
            pl.BlockSpec((1, 1), lambda b: (0, 0)),                       # lin_b
        ],
        out_specs=pl.BlockSpec((1, 1, GATE), lambda b: (b, 0, 0)),
        scratch_shapes=[pltpu.VMEM((N_POS, GATE), jnp.float32),           # per-node h state
                        pltpu.VMEM((N_POS, GATE), jnp.float32)],          # per-node c state
        compiler_params=pltpu.CompilerParams(
            dimension_semantics=("parallel",)),                           # trees shard across TCs (v7x)
    )


@jax.jit
def tree_lstm_forward(packed, tokens, h0, c0, labels):
    """tokens (B, N_NODES) int, h0/c0 (B, N_NODES, H), labels (B,) -> (probs (B,), losses (B,))."""
    del h0   # never read: apply_node_func overwrites every node's h before it is used
    B = tokens.shape[0]
    tok_leaf = tokens[:, LEAF_NODE_ORDER].astype(jnp.int32)[..., None]          # (B, 4, 1)
    c0_leaf = jnp.zeros((B, N_LEAVES, GATE), jnp.float32).at[:, :, :H_SIZE].set(
        c0[:, LEAF_NODE_ORDER, :].astype(jnp.float32))                          # (B, 4, 128)
    lab = labels.reshape(B, 1, 1).astype(jnp.float32)
    out = _make_call(B)(tok_leaf, lab, c0_leaf,
                        packed['leaf_tab'], packed['W_top'], packed['W_bot'],
                        packed['b_fused'], packed['lin_w'], packed['lin_b'])
    return out[:, 0, 0], out[:, 0, 1]                                           # probs, losses


# --------------------------------------------------------------------- pure-JAX reference
def tree_lstm_reference(params, tokens, h0, c0, label):
    hp = jax.lax.Precision.HIGHEST
    H = H_SIZE
    embeds = params['emb'][tokens]
    iou_all = jnp.dot(embeds, params['W_iou_t'], precision=hp)
    h, c = h0, c0

    def apply_node(iou, c_node):
        iou = iou + params['b_iou']
        i, o, u = iou[:, :H], iou[:, H:2 * H], iou[:, 2 * H:]
        i, o, u = jax.nn.sigmoid(i), jax.nn.sigmoid(o), jnp.tanh(u)
        cc = i * u + c_node
        return o * jnp.tanh(cc), cc

    h_leaf, c_leaf = apply_node(iou_all[LEAF_POS:], c0[LEAF_POS:])
    h = h.at[LEAF_POS:].set(h_leaf)
    c = c.at[LEAF_POS:].set(c_leaf)

    for level in range(DEPTH - 2, -1, -1):
        parents = jnp.arange(2 ** level - 1, 2 ** (level + 1) - 1)
        left, right = 2 * parents + 1, 2 * parents + 2
        hcat = jnp.concatenate([h[left], h[right]], axis=1)
        f = jax.nn.sigmoid(jnp.dot(hcat, params['U_f_t'], precision=hp) + params['U_f_b'])
        c_red = f[:, :H] * c[left] + f[:, H:] * c[right]
        iou = jnp.dot(hcat, params['U_iou_t'], precision=hp)
        h_new, c_new = apply_node(iou, c_red)
        h = h.at[parents].set(h_new)
        c = c.at[parents].set(c_new)

    logits = jnp.dot(h[0:1], params['lin_w_t'], precision=hp) + params['lin_b']
    prob = jax.nn.sigmoid(logits)
    z, y = logits.reshape(1), label.reshape(1)
    loss = jnp.mean(jnp.maximum(z, 0.0) - z * y + jnp.log1p(jnp.exp(-jnp.abs(z))))
    return prob, loss


if __name__ == "__main__":
    key = jax.random.PRNGKey(0)
    ks = jax.random.split(key, 10)
    f32 = jnp.float32
    B = 2   # two trees per launch to exercise the batched "parallel" grid axis

    params = {
        'emb':     jax.random.normal(ks[0], (NUM_VOCABS, X_SIZE), f32) * 0.1,
        # torch Linear weight is (out, in); these are stored pre-transposed as (in, out)
        'W_iou_t': jax.random.normal(ks[1], (X_SIZE, 3 * H_SIZE), f32) * 0.1,
        'U_iou_t': jax.random.normal(ks[2], (2 * H_SIZE, 3 * H_SIZE), f32) * 0.1,
        'b_iou':   jax.random.normal(ks[3], (1, 3 * H_SIZE), f32) * 0.1,
        'U_f_t':   jax.random.normal(ks[4], (2 * H_SIZE, 2 * H_SIZE), f32) * 0.1,
        'U_f_b':   jax.random.normal(ks[5], (1, 2 * H_SIZE), f32) * 0.1,
        'lin_w_t': jax.random.normal(ks[6], (H_SIZE, NUM_CLASSES), f32) * 0.1,
        'lin_b':   jax.random.normal(ks[7], (1, NUM_CLASSES), f32) * 0.1,
    }

    tokens = jax.random.randint(ks[8], (B, N_NODES), 0, NUM_VOCABS)
    h0 = jnp.zeros((B, N_NODES, H_SIZE), f32)
    c0 = jax.random.normal(ks[9], (B, N_NODES, H_SIZE), f32) * 0.1
    labels = jnp.array([1.0, 0.0], f32)

    packed = pack_params(params)
    probs, losses = tree_lstm_forward(packed, tokens, h0, c0, labels)
    jax.block_until_ready((probs, losses))

    for b in range(B):
        prob_ref, loss_ref = tree_lstm_reference(params, tokens[b], h0[b], c0[b], labels[b])
        np.testing.assert_allclose(np.asarray(probs[b]), np.asarray(prob_ref).reshape(()),
                                   rtol=1e-3, atol=1e-3)
        np.testing.assert_allclose(np.asarray(losses[b]), np.asarray(loss_ref),
                                   rtol=1e-3, atol=1e-3)

    print("KERNEL_OK")
</pallas_src>

<mosaic_0001>
module attributes {stable_mosaic.version = 11 : i64} {
  func.func @_tree_lstm_kernel(%arg0: i32, %arg1: memref<1x4x1xi32, #tpu.memory_space<vmem>>, %arg2: memref<1x1x1xf32, #tpu.memory_space<vmem>>, %arg3: memref<1x4x128xf32, #tpu.memory_space<vmem>>, %arg4: memref<128x384xf32, #tpu.memory_space<vmem>>, %arg5: memref<128x640xf32, #tpu.memory_space<vmem>>, %arg6: memref<128x640xf32, #tpu.memory_space<vmem>>, %arg7: memref<1x640xf32, #tpu.memory_space<vmem>>, %arg8: memref<1x128xf32, #tpu.memory_space<vmem>>, %arg9: memref<1x1xf32, #tpu.memory_space<vmem>>, %arg10: memref<1x1x128xf32, #tpu.memory_space<vmem>>, %arg11: memref<8x128xf32, #tpu.memory_space<vmem>>, %arg12: memref<8x128xf32, #tpu.memory_space<vmem>>) attributes {dimension_semantics = [#tpu.dimension_semantics<parallel>], iteration_bounds = array<i64: 2>, scalar_prefetch = 0 : i64, scratch_operands = 2 : i64, tpu.core_type = #tpu.core_type<tc>, window_params = [{transform_indices = @transform_0, window_bounds = array<i64: 1, 4, 1>}, {transform_indices = @transform_1, window_bounds = array<i64: 1, 1, 1>}, {transform_indices = @transform_2, window_bounds = array<i64: 1, 4, 128>}, {pipeline_mode = #tpu.pipeline_mode<synchronous>, transform_indices = @transform_3, window_bounds = array<i64: 128, 384>}, {pipeline_mode = #tpu.pipeline_mode<synchronous>, transform_indices = @transform_4, window_bounds = array<i64: 128, 640>}, {pipeline_mode = #tpu.pipeline_mode<synchronous>, transform_indices = @transform_5, window_bounds = array<i64: 128, 640>}, {pipeline_mode = #tpu.pipeline_mode<synchronous>, transform_indices = @transform_6, window_bounds = array<i64: 1, 640>}, {pipeline_mode = #tpu.pipeline_mode<synchronous>, transform_indices = @transform_7, window_bounds = array<i64: 1, 128>}, {pipeline_mode = #tpu.pipeline_mode<synchronous>, transform_indices = @transform_8, window_bounds = array<i64: 1, 1>}, {transform_indices = @transform_9, window_bounds = array<i64: 1, 1, 128>}]} {
    %c0 = arith.constant 0 : index
    %c0_0 = arith.constant 0 : index
    %c0_1 = arith.constant 0 : index
    %0 = vector.load %arg1[%c0, %c0_0, %c0_1] : memref<1x4x1xi32, #tpu.memory_space<vmem>>, vector<1x4x1xi32>
    %1 = vector.shape_cast %0 : vector<1x4x1xi32> to vector<4x1xi32>
    %2 = tpu.iota {dimensions = array<i32: 1>} : vector<4x128xi32>
    %3 = vector.broadcast %1 : vector<4x1xi32> to vector<4x128xi32>
    %4 = arith.cmpi eq, %2, %3 : vector<4x128xi32>
    %5 = arith.extui %4 : vector<4x128xi1> to vector<4x128xi32>
    %6 = arith.sitofp %5 : vector<4x128xi32> to vector<4x128xf32>
    %c0_2 = arith.constant 0 : index
    %c0_3 = arith.constant 0 : index
    %7 = vector.load %arg4[%c0_2, %c0_3] : memref<128x384xf32, #tpu.memory_space<vmem>>, vector<128x384xf32>
    %cst = arith.constant dense<0.000000e+00> : vector<4x384xf32>
    %8 = tpu.matmul %6, %7, %cst {dimension_numbers = #tpu.dot_dimension_numbers<[1], [0], [0], [1], [0, 0, 1, 1], [], []>} : vector<4x128xf32>, vector<128x384xf32>, vector<4x384xf32> -> vector<4x384xf32>
    %9 = vector.extract_strided_slice %8 {offsets = [0, 0], sizes = [4, 256], strides = [1, 1]} : vector<4x384xf32> to vector<4x256xf32>
    %10 = arith.negf %9 : vector<4x256xf32>
    %11 = math.exp %10 : vector<4x256xf32>
    %cst_4 = arith.constant 1.000000e+00 : f32
    %12 = vector.broadcast %cst_4 : f32 to vector<4x256xf32>
    %13 = arith.addf %12, %11 : vector<4x256xf32>
    %14 = arith.divf %12, %13 : vector<4x256xf32>
    %15 = vector.extract_strided_slice %14 {offsets = [0, 0], sizes = [4, 128], strides = [1, 1]} : vector<4x256xf32> to vector<4x128xf32>
    %16 = vector.extract_strided_slice %14 {offsets = [0, 128], sizes = [4, 128], strides = [1, 1]} : vector<4x256xf32> to vector<4x128xf32>
    %17 = vector.extract_strided_slice %8 {offsets = [0, 256], sizes = [4, 128], strides = [1, 1]} : vector<4x384xf32> to vector<4x128xf32>
    %18 = math.tanh %17 : vector<4x128xf32>
    %19 = arith.mulf %15, %18 : vector<4x128xf32>
    %c0_5 = arith.constant 0 : index
    %c0_6 = arith.constant 0 : index
    %c0_7 = arith.constant 0 : index
    %20 = vector.load %arg3[%c0_5, %c0_6, %c0_7] : memref<1x4x128xf32, #tpu.memory_space<vmem>>, vector<1x4x128xf32>
    %21 = vector.shape_cast %20 : vector<1x4x128xf32> to vector<4x128xf32>
    %22 = arith.addf %19, %21 : vector<4x128xf32>
    %23 = math.tanh %22 : vector<4x128xf32>
    %24 = arith.mulf %16, %23 : vector<4x128xf32>
    %c3 = arith.constant 3 : index
    %c0_8 = arith.constant 0 : index
    %25 = vector.load %arg11[%c3, %c0_8] : memref<8x128xf32, #tpu.memory_space<vmem>>, vector<4x128xf32>
    tpu.vector_store %arg11[%c3, %c0_8], %24 {strides = array<i32>} : memref<8x128xf32, #tpu.memory_space<vmem>>, vector<4x128xf32>,
    %c3_9 = arith.constant 3 : index
    %c0_10 = arith.constant 0 : index
    %26 = vector.load %arg12[%c3_9, %c0_10] : memref<8x128xf32, #tpu.memory_space<vmem>>, vector<4x128xf32>
    tpu.vector_store %arg12[%c3_9, %c0_10], %22 {strides = array<i32>} : memref<8x128xf32, #tpu.memory_space<vmem>>, vector<4x128xf32>,
    %c3_11 = arith.constant 3 : index
    %c0_12 = arith.constant 0 : index
    %27 = vector.load %arg11[%c3_11, %c0_12] : memref<8x128xf32, #tpu.memory_space<vmem>>, vector<2x128xf32>
    %c5 = arith.constant 5 : index
    %c0_13 = arith.constant 0 : index
    %28 = vector.load %arg11[%c5, %c0_13] : memref<8x128xf32, #tpu.memory_space<vmem>>, vector<2x128xf32>
    %c0_14 = arith.constant 0 : index
    %c0_15 = arith.constant 0 : index
    %29 = vector.load %arg5[%c0_14, %c0_15] : memref<128x640xf32, #tpu.memory_space<vmem>>, vector<128x640xf32>
    %cst_16 = arith.constant dense<0.000000e+00> : vector<2x640xf32>
    %30 = tpu.matmul %27, %29, %cst_16 {dimension_numbers = #tpu.dot_dimension_numbers<[1], [0], [0], [1], [0, 0, 1, 1], [], []>} : vector<2x128xf32>, vector<128x640xf32>, vector<2x640xf32> -> vector<2x640xf32>
    %c0_17 = arith.constant 0 : index
    %c0_18 = arith.constant 0 : index
    %31 = vector.load %arg6[%c0_17, %c0_18] : memref<128x640xf32, #tpu.memory_space<vmem>>, vector<128x640xf32>
    %cst_19 = arith.constant dense<0.000000e+00> : vector<2x640xf32>
    %32 = tpu.matmul %28, %31, %cst_19 {dimension_numbers = #tpu.dot_dimension_numbers<[1], [0], [0], [1], [0, 0, 1, 1], [], []>} : vector<2x128xf32>, vector<128x640xf32>, vector<2x640xf32> -> vector<2x640xf32>
    %33 = arith.addf %30, %32 : vector<2x640xf32>
    %c0_20 = arith.constant 0 : index
    %c0_21 = arith.constant 0 : index
    %34 = vector.load %arg7[%c0_20, %c0_21] : memref<1x640xf32, #tpu.memory_space<vmem>>, vector<1x640xf32>
    %35 = vector.broadcast %34 : vector<1x640xf32> to vector<2x640xf32>
    %36 = arith.addf %33, %35 : vector<2x640xf32>
    %37 = vector.extract_strided_slice %36 {offsets = [0, 0], sizes = [2, 512], strides = [1, 1]} : vector<2x640xf32> to vector<2x512xf32>
    %38 = arith.negf %37 : vector<2x512xf32>
    %39 = math.exp %38 : vector<2x512xf32>
    %cst_22 = arith.constant 1.000000e+00 : f32
    %40 = vector.broadcast %cst_22 : f32 to vector<2x512xf32>
    %41 = arith.addf %40, %39 : vector<2x512xf32>
    %42 = arith.divf %40, %41 : vector<2x512xf32>
    %43 = vector.extract_strided_slice %42 {offsets = [0, 0], sizes = [2, 128], strides = [1, 1]} : vector<2x512xf32> to vector<2x128xf32>
    %44 = vector.extract_strided_slice %42 {offsets = [0, 128], sizes = [2, 128], strides = [1, 1]} : vector<2x512xf32> to vector<2x128xf32>
    %45 = vector.extract_strided_slice %42 {offsets = [0, 256], sizes = [2, 128], strides = [1, 1]} : vector<2x512xf32> to vector<2x128xf32>
    %46 = vector.extract_strided_slice %42 {offsets = [0, 384], sizes = [2, 128], strides = [1, 1]} : vector<2x512xf32> to vector<2x128xf32>
    %47 = vector.extract_strided_slice %36 {offsets = [0, 512], sizes = [2, 128], strides = [1, 1]} : vector<2x640xf32> to vector<2x128xf32>
    %48 = math.tanh %47 : vector<2x128xf32>
    %c3_23 = arith.constant 3 : index
    %c0_24 = arith.constant 0 : index
    %49 = vector.load %arg12[%c3_23, %c0_24] : memref<8x128xf32, #tpu.memory_space<vmem>>, vector<2x128xf32>
    %50 = arith.mulf %43, %49 : vector<2x128xf32>
    %c5_25 = arith.constant 5 : index
    %c0_26 = arith.constant 0 : index
    %51 = vector.load %arg12[%c5_25, %c0_26] : memref<8x128xf32, #tpu.memory_space<vmem>>, vector<2x128xf32>
    %52 = arith.mulf %44, %51 : vector<2x128xf32>
    %53 = arith.addf %50, %52 : vector<2x128xf32>
    %54 = arith.mulf %45, %48 : vector<2x128xf32>
    %55 = arith.addf %54, %53 : vector<2x128xf32>
    %56 = math.tanh %55 : vector<2x128xf32>
    %57 = arith.mulf %46, %56 : vector<2x128xf32>
    %c1 = arith.constant 1 : index
    %c0_27 = arith.constant 0 : index
    %58 = vector.load %arg11[%c1, %c0_27] : memref<8x128xf32, #tpu.memory_space<vmem>>, vector<2x128xf32>
    tpu.vector_store %arg11[%c1, %c0_27], %57 {strides = array<i32>} : memref<8x128xf32, #tpu.memory_space<vmem>>, vector<2x128xf32>,
    %c1_28 = arith.constant 1 : index
    %c0_29 = arith.constant 0 : index
    %59 = vector.load %arg12[%c1_28, %c0_29] : memref<8x128xf32, #tpu.memory_space<vmem>>, vector<2x128xf32>
    tpu.vector_store %arg12[%c1_28, %c0_29], %55 {strides = array<i32>} : memref<8x128xf32, #tpu.memory_space<vmem>>, vector<2x128xf32>,
    %c1_30 = arith.constant 1 : index
    %c0_31 = arith.constant 0 : index
    %60 = vector.load %arg11[%c1_30, %c0_31] : memref<8x128xf32, #tpu.memory_space<vmem>>, vector<1x128xf32>
    %c2 = arith.constant 2 : index
    %c0_32 = arith.constant 0 : index
    %61 = vector.load %arg11[%c2, %c0_32] : memref<8x128xf32, #tpu.memory_space<vmem>>, vector<1x128xf32>
    %c0_33 = arith.constant 0 : index
    %c0_34 = arith.constant 0 : index
    %62 = vector.load %arg5[%c0_33, %c0_34] : memref<128x640xf32, #tpu.memory_space<vmem>>, vector<128x640xf32>
    %cst_35 = arith.constant dense<0.000000e+00> : vector<1x640xf32>
    %63 = tpu.matmul %60, %62, %cst_35 {dimension_numbers = #tpu.dot_dimension_numbers<[1], [0], [0], [1], [0, 0, 1, 1], [], []>} : vector<1x128xf32>, vector<128x640xf32>, vector<1x640xf32> -> vector<1x640xf32>
    %c0_36 = arith.constant 0 : index
    %c0_37 = arith.constant 0 : index
    %64 = vector.load %arg6[%c0_36, %c0_37] : memref<128x640xf32, #tpu.memory_space<vmem>>, vector<128x640xf32>
    %cst_38 = arith.constant dense<0.000000e+00> : vector<1x640xf32>
    %65 = tpu.matmul %61, %64, %cst_38 {dimension_numbers = #tpu.dot_dimension_numbers<[1], [0], [0], [1], [0, 0, 1, 1], [], []>} : vector<1x128xf32>, vector<128x640xf32>, vector<1x640xf32> -> vector<1x640xf32>
    %66 = arith.addf %63, %65 : vector<1x640xf32>
    %c0_39 = arith.constant 0 : index
    %c0_40 = arith.constant 0 : index
    %67 = vector.load %arg7[%c0_39, %c0_40] : memref<1x640xf32, #tpu.memory_space<vmem>>, vector<1x640xf32>
    %68 = arith.addf %66, %67 : vector<1x640xf32>
    %69 = vector.extract_strided_slice %68 {offsets = [0, 0], sizes = [1, 512], strides = [1, 1]} : vector<1x640xf32> to vector<1x512xf32>
    %70 = arith.negf %69 : vector<1x512xf32>
    %71 = math.exp %70 : vector<1x512xf32>
    %cst_41 = arith.constant 1.000000e+00 : f32
    %72 = vector.broadcast %cst_41 : f32 to vector<1x512xf32>
    %73 = arith.addf %72, %71 : vector<1x512xf32>
    %74 = arith.divf %72, %73 : vector<1x512xf32>
    %75 = vector.extract_strided_slice %74 {offsets = [0, 0], sizes = [1, 128], strides = [1, 1]} : vector<1x512xf32> to vector<1x128xf32>
    %76 = vector.extract_strided_slice %74 {offsets = [0, 128], sizes = [1, 128], strides = [1, 1]} : vector<1x512xf32> to vector<1x128xf32>
    %77 = vector.extract_strided_slice %74 {offsets = [0, 256], sizes = [1, 128], strides = [1, 1]} : vector<1x512xf32> to vector<1x128xf32>
    %78 = vector.extract_strided_slice %74 {offsets = [0, 384], sizes = [1, 128], strides = [1, 1]} : vector<1x512xf32> to vector<1x128xf32>
    %79 = vector.extract_strided_slice %68 {offsets = [0, 512], sizes = [1, 128], strides = [1, 1]} : vector<1x640xf32> to vector<1x128xf32>
    %80 = math.tanh %79 : vector<1x128xf32>
    %c1_42 = arith.constant 1 : index
    %c0_43 = arith.constant 0 : index
    %81 = vector.load %arg12[%c1_42, %c0_43] : memref<8x128xf32, #tpu.memory_space<vmem>>, vector<1x128xf32>
    %82 = arith.mulf %75, %81 : vector<1x128xf32>
    %c2_44 = arith.constant 2 : index
    %c0_45 = arith.constant 0 : index
    %83 = vector.load %arg12[%c2_44, %c0_45] : memref<8x128xf32, #tpu.memory_space<vmem>>, vector<1x128xf32>
    %84 = arith.mulf %76, %83 : vector<1x128xf32>
    %85 = arith.addf %82, %84 : vector<1x128xf32>
    %86 = arith.mulf %77, %80 : vector<1x128xf32>
    %87 = arith.addf %86, %85 : vector<1x128xf32>
    %88 = math.tanh %87 : vector<1x128xf32>
    %89 = arith.mulf %78, %88 : vector<1x128xf32>
    %c0_46 = arith.constant 0 : index
    %c0_47 = arith.constant 0 : index
    %90 = vector.load %arg11[%c0_46, %c0_47] : memref<8x128xf32, #tpu.memory_space<vmem>>, vector<1x128xf32>
    tpu.vector_store %arg11[%c0_46, %c0_47], %89 {strides = array<i32>} : memref<8x128xf32, #tpu.memory_space<vmem>>, vector<1x128xf32>,
    %c0_48 = arith.constant 0 : index
    %c0_49 = arith.constant 0 : index
    %91 = vector.load %arg12[%c0_48, %c0_49] : memref<8x128xf32, #tpu.memory_space<vmem>>, vector<1x128xf32>
    tpu.vector_store %arg12[%c0_48, %c0_49], %87 {strides = array<i32>} : memref<8x128xf32, #tpu.memory_space<vmem>>, vector<1x128xf32>,
    %c0_50 = arith.constant 0 : index
    %c0_51 = arith.constant 0 : index
    %92 = vector.load %arg11[%c0_50, %c0_51] : memref<8x128xf32, #tpu.memory_space<vmem>>, vector<1x128xf32>
    %c0_52 = arith.constant 0 : index
    %c0_53 = arith.constant 0 : index
    %93 = vector.load %arg8[%c0_52, %c0_53] : memref<1x128xf32, #tpu.memory_space<vmem>>, vector<1x128xf32>
    %94 = arith.mulf %92, %93 : vector<1x128xf32>
    %cst_54 = arith.constant dense<0.000000e+00> : vector<1xf32>
    %95 = vector.multi_reduction <add>, %94, %cst_54 [1] : vector<1x128xf32> to vector<1xf32>
    %96 = vector.shape_cast %95 : vector<1xf32> to vector<1x1xf32>
    %c0_55 = arith.constant 0 : index
    %c0_56 = arith.constant 0 : index
    %97 = vector.load %arg9[%c0_55, %c0_56] : memref<1x1xf32, #tpu.memory_space<vmem>>, vector<1x1xf32>
    %98 = arith.addf %96, %97 : vector<1x1xf32>
    %99 = arith.negf %98 : vector<1x1xf32>
    %100 = math.exp %99 : vector<1x1xf32>
    %cst_57 = arith.constant 1.000000e+00 : f32
    %101 = vector.broadcast %cst_57 : f32 to vector<1x1xf32>
    %102 = arith.addf %101, %100 : vector<1x1xf32>
    %103 = arith.divf %101, %102 : vector<1x1xf32>
    %c0_58 = arith.constant 0 : index
    %c0_59 = arith.constant 0 : index
    %c0_60 = arith.constant 0 : index
    %104 = vector.load %arg2[%c0_58, %c0_59, %c0_60] : memref<1x1x1xf32, #tpu.memory_space<vmem>>, vector<1x1x1xf32>
    %105 = vector.shape_cast %104 : vector<1x1x1xf32> to vector<1x1xf32>
    %cst_61 = arith.constant 0.000000e+00 : f32
    %106 = vector.broadcast %cst_61 : f32 to vector<1x1xf32>
    %107 = arith.maximumf %98, %106 : vector<1x1xf32>
    %108 = arith.mulf %98, %105 : vector<1x1xf32>
    %109 = arith.subf %107, %108 : vector<1x1xf32>
    %110 = math.absf %98 : vector<1x1xf32>
    %cst_62 = arith.constant 0.000000e+00 : f32
    %111 = vector.broadcast %cst_62 : f32 to vector<1x1xf32>
    %112 = arith.subf %111, %110 : vector<1x1xf32>
    %113 = math.exp %112 : vector<1x1xf32>
    %114 = math.log1p %113 : vector<1x1xf32>
    %115 = arith.addf %109, %114 : vector<1x1xf32>
    %116 = tpu.iota {dimensions = array<i32: 1>} : vector<1x128xi32>
    %c0_i32 = arith.constant 0 : i32
    %117 = vector.broadcast %c0_i32 : i32 to vector<1x128xi32>
    %118 = arith.cmpi eq, %116, %117 : vector<1x128xi32>
    %c1_i32 = arith.constant 1 : i32
    %119 = vector.broadcast %c1_i32 : i32 to vector<1x128xi32>
    %120 = arith.cmpi eq, %116, %119 : vector<1x128xi32>
    %cst_63 = arith.constant 0.000000e+00 : f32
    %121 = vector.shape_cast %115 : vector<1x1xf32> to vector<1x1xf32>
    %122 = vector.broadcast %121 : vector<1x1xf32> to vector<1x128xf32>
    %123 = vector.broadcast %cst_63 : f32 to vector<1x128xf32>
    %124 = arith.select %120, %122, %123 : vector<1x128xi1>, vector<1x128xf32>
    %125 = vector.shape_cast %103 : vector<1x1xf32> to vector<1x1xf32>
    %126 = vector.broadcast %125 : vector<1x1xf32> to vector<1x128xf32>
    %127 = arith.select %118, %126, %124 : vector<1x128xi1>, vector<1x128xf32>
    %c0_64 = arith.constant 0 : index
    %c0_65 = arith.constant 0 : index
    %c0_66 = arith.constant 0 : index
    %128 = vector.load %arg10[%c0_64, %c0_65, %c0_66] : memref<1x1x128xf32, #tpu.memory_space<vmem>>, vector<1x1x128xf32>
    %129 = vector.shape_cast %128 : vector<1x1x128xf32> to vector<1x128xf32>
    %130 = vector.shape_cast %127 : vector<1x128xf32> to vector<1x1x128xf32>
    tpu.vector_store %arg10[%c0_64, %c0_65, %c0_66], %130 {strides = array<i32>} : memref<1x1x128xf32, #tpu.memory_space<vmem>>, vector<1x1x128xf32>,
    return
  }
  func.func @transform_0(%arg0: i32) -> (i32, i32, i32) {
    %c0_i32 = arith.constant 0 : i32
    %c0_i32_0 = arith.constant 0 : i32
    %c0_i32_1 = arith.constant 0 : i32
    return %arg0, %c0_i32, %c0_i32_0 : i32, i32, i32
  }
  func.func @transform_1(%arg0: i32) -> (i32, i32, i32) {
    %c0_i32 = arith.constant 0 : i32
    %c0_i32_0 = arith.constant 0 : i32
    %c0_i32_1 = arith.constant 0 : i32
    return %arg0, %c0_i32, %c0_i32_0 : i32, i32, i32
  }
  func.func @transform_2(%arg0: i32) -> (i32, i32, i32) {
    %c0_i32 = arith.constant 0 : i32
    %c0_i32_0 = arith.constant 0 : i32
    %c0_i32_1 = arith.constant 0 : i32
    return %arg0, %c0_i32, %c0_i32_0 : i32, i32, i32
  }
  func.func @transform_3(%arg0: i32) -> (i32, i32) {
    %c0_i32 = arith.constant 0 : i32
    %c0_i32_0 = arith.constant 0 : i32
    %c0_i32_1 = arith.constant 0 : i32
    return %c0_i32, %c0_i32_0 : i32, i32
  }
  func.func @transform_4(%arg0: i32) -> (i32, i32) {
    %c0_i32 = arith.constant 0 : i32
    %c0_i32_0 = arith.constant 0 : i32
    %c0_i32_1 = arith.constant 0 : i32
    return %c0_i32, %c0_i32_0 : i32, i32
  }
  func.func @transform_5(%arg0: i32) -> (i32, i32) {
    %c0_i32 = arith.constant 0 : i32
    %c0_i32_0 = arith.constant 0 : i32
    %c0_i32_1 = arith.constant 0 : i32
    return %c0_i32, %c0_i32_0 : i32, i32
  }
  func.func @transform_6(%arg0: i32) -> (i32, i32) {
    %c0_i32 = arith.constant 0 : i32
    %c0_i32_0 = arith.constant 0 : i32
    %c0_i32_1 = arith.constant 0 : i32
    return %c0_i32, %c0_i32_0 : i32, i32
  }
  func.func @transform_7(%arg0: i32) -> (i32, i32) {
    %c0_i32 = arith.constant 0 : i32
    %c0_i32_0 = arith.constant 0 : i32
    %c0_i32_1 = arith.constant 0 : i32
    return %c0_i32, %c0_i32_0 : i32, i32
  }
  func.func @transform_8(%arg0: i32) -> (i32, i32) {
    %c0_i32 = arith.constant 0 : i32
    %c0_i32_0 = arith.constant 0 : i32
    %c0_i32_1 = arith.constant 0 : i32
    return %c0_i32, %c0_i32_0 : i32, i32
  }
  func.func @transform_9(%arg0: i32) -> (i32, i32, i32) {
    %c0_i32 = arith.constant 0 : i32
    %c0_i32_0 = arith.constant 0 : i32
    %c0_i32_1 = arith.constant 0 : i32
    return %arg0, %c0_i32, %c0_i32_0 : i32, i32, i32
  }
}

</mosaic_0001>

<bundles_post_ra>
// kernel: tree_lstm_forward.1
= control target key start
LH: loop header
LB: loop body
LE: loop exit
PB: predicated region body
PF: predicated region fallthrough
CT: control target
= control target key end

     0   :  { %s3630_s0 = inlined_call_operand.vmem [shape: s32[2,4,1], index: 0, kind: input, shape index: {}]   ;;  %s3631_s1 = inlined_call_operand.vmem [shape: f32[2,1,1], index: 1, kind: input, shape index: {}]   ;;  %s3632_s2 = inlined_call_operand.vmem [shape: f32[2,4,128], index: 2, kind: input, shape index: {}]   ;;  %s3633_s3 = inlined_call_operand.hbm [shape: f32[128,384], index: 3, kind: input, shape index: {}]   ;;  %s3634_s4 = inlined_call_operand.hbm [shape: f32[128,640], index: 4, kind: input, shape index: {}]   ;;  %s3635_s5 = inlined_call_operand.hbm [shape: f32[128,640], index: 5, kind: input, shape index: {}]   ;;  %s3636_s6 = inlined_call_operand.vmem [shape: f32[1,640], index: 6, kind: input, shape index: {}]   ;;  %s3637_s7 = inlined_call_operand.vmem [shape: f32[1,128], index: 7, kind: input, shape index: {}]   ;;  %s3638_s8 = inlined_call_operand.<no memory space> [shape: f32[1,1], index: 8, kind: input, shape index: {}]   ;;  %s3639_s9 = inlined_call_operand.vmem [shape: f32[2,1,128], index: 9, kind: output, shape index: {}]  }
   0x1   :  { %v14_v0 = vstv %s3638_s8 }
   0x2   :  { %15 = vst [vmem:[#allocation4] sm:$0x1] %v14_v0 }
   0x3   :  { %16 = vsyncpa [#allocation6], 0 }
   0x4   :  { %17 = vsyncpa [#allocation8], 0  ;;  %s3056_s11 = smov 0  }
   0x5 LB: > { %s2991_s12 = smov [#allocation7]   ;;  %s3062_s14 = sadd.s32 4294967295, %s2989_s11   ;;  %s2989_s11 = sphi %s3056_s11, %s23_s11  }
   0x6   : > { %s283_s13 = sshll.u32 %s2991_s12, 4  ;;  %p2078_p0 = scmp.ge.s32.totalorder %s2989_s11, 1  ;;  %s3071_s13 = int_to_ptr.vmem [resolvable:$true] %s283_s13 }
   0x7   : > { %p258_p1 = scmp.lt.s32.totalorder %s2989_s11, 3  ;;  %p3640_p2 = scmp.eq.s32.totalorder %s3062_s14, 0 }
   0x8   : > { %s2992_s15 = smov [#allocation5]   ;;  %s2993_s18 = smov [#allocation9]  }
   0x9   : > { %p3067_p3 = pnand %p2078_p0, %p258_p1  ;;  %s270_s16 = sshll.u32 %s2992_s15, 4  ;;  %s3075_s16 = int_to_ptr.vmem [resolvable:$true] %s270_s16 }
   0xa   : > { %s3083_s19 = sshll.u32 %s2993_s18, 4  ;;  %s2891_s22 = scalar_lea.hbm %s3634_s4, 10240  ;;  %s297_s19 = int_to_ptr.vmem [resolvable:$true] %s3083_s19 }
   0xb   : > { %s3675_s8 = scalar_select %p3067_p3, 1, 0 }
   0xc   : > { %p2793_p4 = pneg %p3067_p3  ;;  %p2892_p6 = scmp.ne.s32.totalorder %s3634_s4, %s2891_s22 }
   0xd   : > { %p2898_p10 = scmp.lt.u32.totalorder %s2891_s22, %s3634_s4 }
   0xe   : > { %p3079_p5 = pnand %p3640_p2, %p2793_p4 }
  0x10   : > { %p3093_p7 = pneg %p3079_p5 }
  0x12   : > { %p2894_p8 = pnand %p3093_p7, %p2892_p6 }
  0x14   : > { %p2895_p9 = pneg %p2894_p8 }
  0x16   : > { %p2900_p11 = pnand %p2898_p10, %p2895_p9 }
  0x18   : > { %2903 = shalt.err (!%p2900_p11)
}
  0x19   : > { %s2904_s28 = scalar_lea.vmem %s3071_s13, 10240  ;;  %p2912_p1 = scmp.lt.s32.totalorder %s3071_s13, %s3071_s13 }
  0x1a   : > { %p2905_p12 = scmp.ne.s32.totalorder %s3071_s13, %s2904_s28  ;;  %p2913_p4 = scmp.lt.s32.totalorder %s2904_s28, %s2904_s28 }
  0x1c   : > { %p2907_p13 = pnand %p2905_p12, %p3093_p7  ;;  %p2914_p6 = por %p2913_p4, %p2912_p1 }
  0x1e   : > { %p2908_p0 = pneg %p2907_p13 }
  0x20   : > { %p2915_p8 = pnand %p2914_p6, %p2908_p0 }
  0x22   : > { %2918 = shalt.err (!%p2915_p8)
}
  0x23   : > { %s2994_s29 = smov 640   ;;  %s2995_s30 = smov 40  }
  0x24   : > { %2799 = dma.hbm_to_vmem [thread:$0]  (!%p3079_p5), %s3634_s4, 10240, %s3071_s13, [#allocation8], %s2994_s29, %s2994_s29, %s2995_s30  }
  0x25   : > { %s2919_s20 = scalar_lea.hbm %s3633_s3, 6144 }
  0x26   : > { %p2920_p9 = scmp.ne.s32.totalorder %s3633_s3, %s2919_s20  ;;  %p2926_p12 = scmp.lt.u32.totalorder %s2919_s20, %s3633_s3 }
  0x28   : > { %p2922_p10 = pnand %p2920_p9, %p3093_p7 }
  0x2a   : > { %p2923_p11 = pneg %p2922_p10 }
  0x2c   : > { %p2928_p13 = pnand %p2926_p12, %p2923_p11 }
  0x2e   : > { %2931 = shalt.err (!%p2928_p13)
}
  0x2f   : > { %s2932_s13 = scalar_lea.vmem %s3075_s16, 6144  ;;  %p2940_p6 = scmp.lt.s32.totalorder %s3075_s16, %s3075_s16 }
  0x30   : > { %p2933_p0 = scmp.ne.s32.totalorder %s3075_s16, %s2932_s13  ;;  %p2941_p8 = scmp.lt.s32.totalorder %s2932_s13, %s2932_s13 }
  0x32   : > { %p2935_p1 = pnand %p2933_p0, %p3093_p7  ;;  %p2942_p9 = por %p2941_p8, %p2940_p6 }
  0x34   : > { %p2936_p4 = pneg %p2935_p1 }
  0x36   : > { %p2943_p10 = pnand %p2942_p9, %p2936_p4 }
  0x38   : > { %2946 = shalt.err (!%p2943_p10)
}
  0x39   : > { %s2996_s26 = smov 384   ;;  %s2997_s27 = smov 24  }
  0x3a   : > { %2796 = dma.hbm_to_vmem [thread:$0]  (!%p3079_p5), %s3633_s3, 6144, %s3075_s16, [#allocation6], %s2996_s26, %s2996_s26, %s2997_s27  }
  0x3b   : > { %s2947_s18 = scalar_lea.hbm %s3635_s5, 10240 }
  0x3c   : > { %p2948_p11 = scmp.ne.s32.totalorder %s3635_s5, %s2947_s18  ;;  %p2954_p0 = scmp.lt.u32.totalorder %s2947_s18, %s3635_s5 }
  0x3e   : > { %p2950_p12 = pnand %p2948_p11, %p3093_p7 }
  0x40   : > { %p2951_p13 = pneg %p2950_p12 }
  0x42   : > { %p2956_p1 = pnand %p2954_p0, %p2951_p13 }
  0x44   : > { %2959 = shalt.err (!%p2956_p1)
}
  0x45   : > { %s2960_s24 = scalar_lea.vmem %s297_s19, 10240  ;;  %p2968_p9 = scmp.lt.s32.totalorder %s297_s19, %s297_s19 }
  0x46   : > { %p2961_p4 = scmp.ne.s32.totalorder %s297_s19, %s2960_s24  ;;  %p2969_p10 = scmp.lt.s32.totalorder %s2960_s24, %s2960_s24 }
  0x48   : > { %p2963_p6 = pnand %p2961_p4, %p3093_p7  ;;  %p2970_p2 = por %p2969_p10, %p2968_p9 }
  0x4a   : > { %p2964_p8 = pneg %p2963_p6 }
  0x4c   : > { %p2971_p3 = pnand %p2970_p2, %p2964_p8 }
  0x4e   : > { %2974 = shalt.err (!%p2971_p3)
}
  0x4f   : > { %2802 = dma.hbm_to_vmem [thread:$0]  (!%p3079_p5), %s3635_s5, 10240, %s297_s19, [#allocation8], %s2994_s29, %s2994_s29, %s2995_s30  }
  0x50   : > { %p3678_p11 = scmp.ne.s32.totalorder %s3675_s8, 0 }
  0x52   : > { %341 = sbr.rel (%p3678_p11) target bundleno = 1475 (0x5c3), region = 56 }
  0x59   : > { %p3679_p7 = scmp.eq.s32.totalorder %s3062_s14, 0 }
  0x5b   : > { %2980 = dma.done.wait (%p3679_p7), [#allocation6], 6144   ;;  %p3680_p12 = pmov %p3679_p7 }
  0x5c   : > { %p3681_p2 = pmov %p3679_p7 }
  0x5d   : > { %2982 = vsyncadd (%p3680_p12), [#allocation6], 4294961152 }
  0x5e   : > { %2984 = dma.done.wait (%p3681_p2), [#allocation8], 20480   ;;  %p3682_p3 = pmov %p3681_p2 }
  0x5f   : > { %p389_p13 = scmp.lt.s32.totalorder %s3062_s14, 1  ;;  %v2998_v1 = vmov 0   ;;  %v2999_v2 = vmov 0.0|0.0   ;;  %v413_v4 = vld [vmem:[#allocation5 + $0x8] sm:$0xff]  ;;  %v416_v5 = vld [vmem:[#allocation5 + $0x20] sm:$0xff]  ;;  %v415_v7 = vld [vmem:[#allocation5 + $0x18] sm:$0xff] }
  0x60   : > { %2986 = vsyncadd (%p3682_p3), [#allocation8], 4294946816  ;;  %2829 = vset.pattern.permute.xlu0 %v2998_v1  ;;  %2397 = vmatprep.subr.bf16.mxu1 %v2999_v2  ;;  %v412_v6 = vld [vmem:[#allocation5] sm:$0xff]  ;;  %v3643_v8 = vmov 0.0   ;;  %v2365_v9 = vpack.c.bf16 %v416_v5, %v413_v4  ;;  %v414_v11 = vld [vmem:[#allocation5 + $0x10] sm:$0xff]  ;;  %vm3001_vm0 = vmmov 0  }
  0x61   : > { %s3744_s14 = smov (!%p389_p13, %s3062_s14), 1  ;;  %2830 = vset.pattern.permute.xlu1 %v2998_v1  ;;  %524 = vmatprep.mubr.f32.mxu0 %v3643_v8  ;;  %v2367_v10 = vpack.c.bf16 %v415_v7, %v412_v6  ;;  %v417_v12 = vld [vmem:[#allocation5 + $0x28] sm:$0xff]  ;;  %v419_v13 = vld [vmem:[#allocation5 + $0x38] sm:$0xff]  ;;  %v422_v15 = vld [vmem:[#allocation5 + $0x50] sm:$0xff]  ;;  %vm1932_vm2 = vcmask 1040384  }
  0x62   : > { %s2087_s8 = sshll.u32 %s3744_s14, 2  ;;  %2222 = vmatprep.mubr.msk.f32.mxu1 %vm3001_vm0, %v3643_v8  ;;  %v2398_v14 = vpack.c.bf16 %v417_v12, %v414_v11  ;;  %v418_v16 = vld [vmem:[#allocation5 + $0x30] sm:$0xff]  ;;  %v421_v17 = vld [vmem:[#allocation5 + $0x48] sm:$0xff]  ;;  %2366 = vmatprep.subr.bf16.mxu0 %v2365_v9  ;;  %v2369_v18 = vpack.c.bf16 %v422_v15, %v419_v13  ;;  %v420_v19 = vld [vmem:[#allocation5 + $0x40] sm:$0xff]  ;;  %v3642_v15 = vlaneseq  ;;  %s395_s22 = scalar_lea.vmem %s3631_s1, %s3744_s14 }
  0x63   : > { %s392_s25 = scalar_lea.vmem %s3630_s0, %s2087_s8  ;;  %v423_v20 = vld [vmem:[#allocation5 + $0x58] sm:$0xff]  ;;  %v425_v21 = vld [vmem:[#allocation5 + $0x68] sm:$0xff]  ;;  %2368 = vmatpush1.bf16.msra.mxu0 %v2367_v10  ;;  %v2371_v22 = vpack.c.bf16 %v421_v17, %v418_v16  ;;  %v428_v24 = vld [vmem:[#allocation5 + $0x80] sm:$0xff]  ;;  %s399_s26 = scalar_lea.vmem %s3632_s2, %s2087_s8 }
  0x64   : > { %v403_v3 = vld [vmem:[%s392_s25] sm:$0xf]  ;;  %2399 = vmatpush3.bf16.msra.mxu1 %v2398_v14  ;;  %v2401_v23 = vpack.c.bf16 %v423_v20, %v420_v19  ;;  %v424_v25 = vld [vmem:[#allocation5 + $0x60] sm:$0xff]  ;;  %2370 = vmatprep.subr.bf16.mxu0 %v2369_v18  ;;  %v2373_v26 = vpack.c.bf16 %v428_v24, %v425_v21  ;;  %v427_v27 = vld [vmem:[#allocation5 + $0x78] sm:$0xff]  ;;  %v3194_v16 = vand.u32 127, %v3642_v15  ;;  %v3002_v18 = vmov 1.0   ;;  %s402_s16 = scalar_lea.vmem %s3639_s9, %s3744_s14 }
  0x65   : > { %407 = vperm.xlu0 %2829, %v403_v3   ;;  %2400 = vmatprep.subr.bf16.mxu1 %v2999_v2  ;;  %v426_v28 = vld [vmem:[#allocation5 + $0x70] sm:$0xff]  ;;  %v429_v29 = vld [vmem:[#allocation5 + $0x88] sm:$0xff]  ;;  %v431_v30 = vld [vmem:[#allocation5 + $0x98] sm:$0xff]  ;;  %v2375_v32 = vpack.c.bf16 %v427_v27, %v424_v25 }
  0x66   : > { %v434_v31 = vld [vmem:[#allocation5 + $0xb0] sm:$0xff]  ;;  %v2404_v33 = vpack.c.bf16 %v429_v29, %v426_v28  ;;  %v433_v36 = vld [vmem:[#allocation5 + $0xa8] sm:$0xff]  ;;  %v432_v37 = vld [vmem:[#allocation5 + $0xa0] sm:$0xff]  ;;  %3683 = vst [vmem:[#allocation12_spill] sm:$0xff] %v3194_v16 }
  0x67   : > { %2372 = vmatpush1.bf16.msra.mxu0 %v2371_v22  ;;  %v430_v34 = vld [vmem:[#allocation5 + $0x90] sm:$0xff]  ;;  %v2377_v35 = vpack.c.bf16 %v434_v31, %v431_v30  ;;  %v435_v38 = vld [vmem:[#allocation5 + $0xb8] sm:$0xff]  ;;  %v437_v39 = vld [vmem:[#allocation5 + $0xc8] sm:$0xff] }
  0x68   : > { %2402 = vmatpush3.bf16.msra.mxu1 %v2401_v23  ;;  %2374 = vmatprep.subr.bf16.mxu0 %v2373_v26  ;;  %v440_v40 = vld [vmem:[#allocation5 + $0xe0] sm:$0xff]  ;;  %v2379_v41 = vpack.c.bf16 %v433_v36, %v430_v34  ;;  %v2407_v42 = vpack.c.bf16 %v435_v38, %v432_v37  ;;  %v439_v45 = vld [vmem:[#allocation5 + $0xd8] sm:$0xff]  ;;  %v438_v46 = vld [vmem:[#allocation5 + $0xd0] sm:$0xff] }
  0x69   : > { %2403 = vmatprep.subr.bf16.mxu1 %v2999_v2  ;;  %v436_v43 = vld [vmem:[#allocation5 + $0xc0] sm:$0xff]  ;;  %v2381_v44 = vpack.c.bf16 %v440_v40, %v437_v39  ;;  %v441_v47 = vld [vmem:[#allocation5 + $0xe8] sm:$0xff]  ;;  %v443_v48 = vld [vmem:[#allocation5 + $0xf8] sm:$0xff] }
  0x6a   : > { %v446_v49 = vld [vmem:[#allocation5 + $0x110] sm:$0xff]  ;;  %v2383_v50 = vpack.c.bf16 %v439_v45, %v436_v43  ;;  %v2410_v51 = vpack.c.bf16 %v441_v47, %v438_v46  ;;  %v445_v54 = vld [vmem:[#allocation5 + $0x108] sm:$0xff]  ;;  %v444_v55 = vld [vmem:[#allocation5 + $0x100] sm:$0xff] }
  0x6b   : > { %2376 = vmatpush1.bf16.msra.mxu0 %v2375_v32  ;;  %v442_v52 = vld [vmem:[#allocation5 + $0xf0] sm:$0xff]  ;;  %v2385_v53 = vpack.c.bf16 %v446_v49, %v443_v48  ;;  %v447_v56 = vld [vmem:[#allocation5 + $0x118] sm:$0xff]  ;;  %v449_v57 = vld [vmem:[#allocation5 + $0x128] sm:$0xff] }
  0x6c   : > { %2405 = vmatpush3.bf16.msra.mxu1 %v2404_v33  ;;  %2378 = vmatprep.subr.bf16.mxu0 %v2377_v35  ;;  %v452_v58 = vld [vmem:[#allocation5 + $0x140] sm:$0xff]  ;;  %v2387_v59 = vpack.c.bf16 %v445_v54, %v442_v52  ;;  %v2413_v60 = vpack.c.bf16 %v447_v56, %v444_v55  ;;  %v451_v63 = vld [vmem:[#allocation5 + $0x138] sm:$0xff]  ;;  %v450_v0 = vld [vmem:[#allocation5 + $0x130] sm:$0xff] }
  0x6d   : > { %2406 = vmatprep.subr.bf16.mxu1 %v2999_v2  ;;  %v448_v61 = vld [vmem:[#allocation5 + $0x120] sm:$0xff]  ;;  %v2389_v62 = vpack.c.bf16 %v452_v58, %v449_v57  ;;  %v453_v1 = vld [vmem:[#allocation5 + $0x148] sm:$0xff]  ;;  %v455_v3 = vld [vmem:[#allocation5 + $0x158] sm:$0xff] }
  0x6e   : > { %v458_v4 = vld [vmem:[#allocation5 + $0x170] sm:$0xff]  ;;  %v2391_v5 = vpack.c.bf16 %v451_v63, %v448_v61  ;;  %v2416_v6 = vpack.c.bf16 %v453_v1, %v450_v0  ;;  %v457_v10 = vld [vmem:[#allocation5 + $0x168] sm:$0xff]  ;;  %v456_v11 = vld [vmem:[#allocation5 + $0x160] sm:$0xff] }
  0x6f   : > { %2380 = vmatpush1.bf16.msra.mxu0 %v2379_v41  ;;  %v454_v7 = vld [vmem:[#allocation5 + $0x150] sm:$0xff]  ;;  %v2393_v9 = vpack.c.bf16 %v458_v4, %v455_v3  ;;  %v459_v12 = vld [vmem:[#allocation5 + $0x178] sm:$0xff]  ;;  %v704_v19 = vld [vmem:[#allocation9 + $0x8] sm:$0xff] }
  0x70   : > { %2408 = vmatpush3.bf16.msra.mxu1 %v2407_v42  ;;  %2382 = vmatprep.subr.bf16.mxu0 %v2381_v44  ;;  %v2395_v13 = vpack.c.bf16 %v457_v10, %v454_v7  ;;  %v2419_v14 = vpack.c.bf16 %v459_v12, %v456_v11  ;;  %v709_v20 = vld [vmem:[#allocation9 + $0x30] sm:$0xff]  ;;  %v706_v21 = vld [vmem:[#allocation9 + $0x18] sm:$0xff]  ;;  %v711_v23 = vld [vmem:[#allocation9 + $0x40] sm:$0xff] }
  0x71   : > { %2409 = vmatprep.subr.bf16.mxu1 %v2999_v2  ;;  %v3199_v22 = vpack.c.bf16 %v709_v20, %v704_v19  ;;  %v703_v24 = vld [vmem:[#allocation9] sm:$0xff]  ;;  %v708_v25 = vld [vmem:[#allocation9 + $0x28] sm:$0xff]  ;;  %v3201_v26 = vpack.c.bf16 %v711_v23, %v706_v21  ;;  %v705_v28 = vld [vmem:[#allocation9 + $0x10] sm:$0xff] }
  0x72   : > { %v3203_v27 = vpack.c.bf16 %v708_v25, %v703_v24  ;;  %v710_v29 = vld [vmem:[#allocation9 + $0x38] sm:$0xff]  ;;  %v719_v32 = vld [vmem:[#allocation9 + $0x80] sm:$0xff]  ;;  %v716_v33 = vld [vmem:[#allocation9 + $0x68] sm:$0xff] }
  0x73   : > { %2384 = vmatpush1.bf16.msra.mxu0 %v2383_v50  ;;  %v3206_v30 = vpack.c.bf16 %v710_v29, %v705_v28  ;;  %v714_v31 = vld [vmem:[#allocation9 + $0x58] sm:$0xff]  ;;  %v721_v35 = vld [vmem:[#allocation9 + $0x90] sm:$0xff]  ;;  %v715_v40 = vld [vmem:[#allocation9 + $0x60] sm:$0xff] }
  0x74   : > { %2411 = vmatpush3.bf16.msra.mxu1 %v2410_v51  ;;  %2386 = vmatprep.subr.bf16.mxu0 %v2385_v53  ;;  %v3211_v34 = vpack.c.bf16 %v719_v32, %v714_v31  ;;  %v713_v36 = vld [vmem:[#allocation9 + $0x50] sm:$0xff]  ;;  %v718_v37 = vld [vmem:[#allocation9 + $0x78] sm:$0xff]  ;;  %v3213_v38 = vpack.c.bf16 %v721_v35, %v716_v33  ;;  %v720_v41 = vld [vmem:[#allocation9 + $0x88] sm:$0xff] }
  0x75   : > { %2412 = vmatprep.subr.bf16.mxu1 %v2999_v2  ;;  %v3215_v39 = vpack.c.bf16 %v718_v37, %v713_v36  ;;  %v3218_v42 = vpack.c.bf16 %v720_v41, %v715_v40  ;;  %v724_v43 = vld [vmem:[#allocation9 + $0xa8] sm:$0xff]  ;;  %v729_v44 = vld [vmem:[#allocation9 + $0xd0] sm:$0xff]  ;;  %v726_v45 = vld [vmem:[#allocation9 + $0xb8] sm:$0xff] }
  0x76   : > { %v3223_v46 = vpack.c.bf16 %v729_v44, %v724_v43  ;;  %v731_v47 = vld [vmem:[#allocation9 + $0xe0] sm:$0xff]  ;;  %v728_v49 = vld [vmem:[#allocation9 + $0xc8] sm:$0xff]  ;;  %v725_v52 = vld [vmem:[#allocation9 + $0xb0] sm:$0xff] }
  0x77   : > { %2388 = vmatpush1.bf16.msra.mxu0 %v2387_v59  ;;  %v723_v48 = vld [vmem:[#allocation9 + $0xa0] sm:$0xff]  ;;  %v3225_v50 = vpack.c.bf16 %v731_v47, %v726_v45  ;;  %v730_v53 = vld [vmem:[#allocation9 + $0xd8] sm:$0xff]  ;;  %v736_v57 = vld [vmem:[#allocation9 + $0x108] sm:$0xff] }
  0x78   : > { %2414 = vmatpush3.bf16.msra.mxu1 %v2413_v60  ;;  %2390 = vmatprep.subr.bf16.mxu0 %v2389_v62  ;;  %v3227_v51 = vpack.c.bf16 %v728_v49, %v723_v48  ;;  %v3230_v54 = vpack.c.bf16 %v730_v53, %v725_v52  ;;  %v734_v55 = vld [vmem:[#allocation9 + $0xf8] sm:$0xff]  ;;  %v739_v56 = vld [vmem:[#allocation9 + $0x120] sm:$0xff]  ;;  %v741_v59 = vld [vmem:[#allocation9 + $0x130] sm:$0xff] }
  0x79   : > { %2415 = vmatprep.subr.bf16.mxu1 %v2999_v2  ;;  %v3235_v58 = vpack.c.bf16 %v739_v56, %v734_v55  ;;  %v733_v60 = vld [vmem:[#allocation9 + $0xf0] sm:$0xff]  ;;  %v738_v61 = vld [vmem:[#allocation9 + $0x118] sm:$0xff]  ;;  %v3237_v62 = vpack.c.bf16 %v741_v59, %v736_v57  ;;  %v735_v0 = vld [vmem:[#allocation9 + $0x100] sm:$0xff] }
  0x7a   : > { %v3239_v63 = vpack.c.bf16 %v738_v61, %v733_v60  ;;  %v740_v1 = vld [vmem:[#allocation9 + $0x128] sm:$0xff]  ;;  %v743_v10 = vld [vmem:[#allocation9 + $0x140] sm:$0xff]  ;;  %v754_v19 = vld [vmem:[#allocation9 + $0x198] sm:$0xff] }
  0x7b   : > { %2392 = vmatpush1.bf16.msra.mxu0 %v2391_v5  ;;  %v3242_v3 = vpack.c.bf16 %v740_v1, %v735_v0  ;;  %v744_v4 = vld [vmem:[#allocation9 + $0x148] sm:$0xff]  ;;  %v749_v5 = vld [vmem:[#allocation9 + $0x170] sm:$0xff]  ;;  %v759_v20 = vld [vmem:[#allocation9 + $0x1c0] sm:$0xff] }
  0x7c   : > { %2417 = vmatpush3.bf16.msra.mxu1 %v2416_v6  ;;  %2394 = vmatprep.subr.bf16.mxu0 %v2393_v9  ;;  %v746_v6 = vld [vmem:[#allocation9 + $0x158] sm:$0xff]  ;;  %v3247_v7 = vpack.c.bf16 %v749_v5, %v744_v4  ;;  %v751_v9 = vld [vmem:[#allocation9 + $0x180] sm:$0xff]  ;;  %v748_v11 = vld [vmem:[#allocation9 + $0x168] sm:$0xff]  ;;  %v3259_v23 = vpack.c.bf16 %v759_v20, %v754_v19 }
  0x7d   : > { %2418 = vmatprep.subr.bf16.mxu1 %v2999_v2  ;;  %v3249_v12 = vpack.c.bf16 %v751_v9, %v746_v6  ;;  %v756_v21 = vld [vmem:[#allocation9 + $0x1a8] sm:$0xff]  ;;  %v761_v24 = vld [vmem:[#allocation9 + $0x1d0] sm:$0xff]  ;;  %v758_v28 = vld [vmem:[#allocation9 + $0x1b8] sm:$0xff] }
  0x7e   : > { %v753_v25 = vld [vmem:[#allocation9 + $0x190] sm:$0xff]  ;;  %v3261_v29 = vpack.c.bf16 %v761_v24, %v756_v21  ;;  %v755_v32 = vld [vmem:[#allocation9 + $0x1a0] sm:$0xff]  ;;  %v760_v33 = vld [vmem:[#allocation9 + $0x1c8] sm:$0xff] }
  0x7f   : > { %2396 = vmatpush1.bf16.msra.mxu0 %v2395_v13  ;;  %v3251_v13 = vpack.c.bf16 %v748_v11, %v743_v10  ;;  %v3263_v31 = vpack.c.bf16 %v758_v28, %v753_v25  ;;  %v3266_v35 = vpack.c.bf16 %v760_v33, %v755_v32  ;;  %v764_v36 = vld [vmem:[#allocation9 + $0x1e8] sm:$0xff]  ;;  %v769_v37 = vld [vmem:[#allocation9 + $0x210] sm:$0xff]  ;;  %v766_v40 = vld [vmem:[#allocation9 + $0x1f8] sm:$0xff] }
  0x80   : > { %2420 = vmatpush3.bf16.msra.mxu1 %v2419_v14  ;;  %2422 = vmatprep.subr.bf16.mxu0 %v3199_v22  ;;  %v745_v14 = vld [vmem:[#allocation9 + $0x150] sm:$0xff]  ;;  %v3271_v41 = vpack.c.bf16 %v769_v37, %v764_v36  ;;  %v771_v43 = vld [vmem:[#allocation9 + $0x220] sm:$0xff]  ;;  %v768_v45 = vld [vmem:[#allocation9 + $0x208] sm:$0xff] }
  0x81   : > { %2454 = vmatprep.subr.bf16.mxu1 %v3201_v26  ;;  %v763_v44 = vld [vmem:[#allocation9 + $0x1e0] sm:$0xff]  ;;  %v3273_v47 = vpack.c.bf16 %v771_v43, %v766_v40  ;;  %v765_v49 = vld [vmem:[#allocation9 + $0x1f0] sm:$0xff]  ;;  %v770_v52 = vld [vmem:[#allocation9 + $0x218] sm:$0xff] }
  0x82   : > { %v3275_v48 = vpack.c.bf16 %v768_v45, %v763_v44  ;;  %v3278_v53 = vpack.c.bf16 %v770_v52, %v765_v49  ;;  %v774_v55 = vld [vmem:[#allocation9 + $0x238] sm:$0xff]  ;;  %v779_v56 = vld [vmem:[#allocation9 + $0x260] sm:$0xff]  ;;  %v776_v57 = vld [vmem:[#allocation9 + $0x248] sm:$0xff] }
  0x83   : > { %v3283_v59 = vpack.c.bf16 %v779_v56, %v774_v55  ;;  %v781_v60 = vld [vmem:[#allocation9 + $0x270] sm:$0xff]  ;;  %v778_v0 = vld [vmem:[#allocation9 + $0x258] sm:$0xff]  ;;  %v775_v5 = vld [vmem:[#allocation9 + $0x240] sm:$0xff] }
  0x84   : > { %v773_v61 = vld [vmem:[#allocation9 + $0x230] sm:$0xff]  ;;  %v3285_v1 = vpack.c.bf16 %v781_v60, %v776_v57  ;;  %v780_v6 = vld [vmem:[#allocation9 + $0x268] sm:$0xff]  ;;  %v626_v9 = vld [vmem:[#allocation7 + $0x18] sm:$0xff] }
  0x85   : > { %v3287_v4 = vpack.c.bf16 %v778_v0, %v773_v61  ;;  %v3290_v10 = vpack.c.bf16 %v780_v6, %v775_v5  ;;  %v631_v11 = vld [vmem:[#allocation7 + $0x40] sm:$0xff]  ;;  %v615_v40 = vld [vmem:[%s399_s26] sm:$0xf]  ;;  %v630_v61 = vld [vmem:[#allocation7 + $0x38] sm:$0xff] }
  0x86   : > { %v707_v56 = vld [vmem:[#allocation9 + $0x20] sm:$0xff]  ;;  %v712_v57 = vld [vmem:[#allocation9 + $0x48] sm:$0xff]  ;;  %v625_v60 = vld [vmem:[#allocation7 + $0x10] sm:$0xff] }
  0x87   : > { %v636_v0 = vld [vmem:[#allocation7 + $0x68] sm:$0xff]  ;;  %v641_v5 = vld [vmem:[#allocation7 + $0x90] sm:$0xff]  ;;  %v3304_v6 = vpack.c.bf16 %v712_v57, %v707_v56  ;;  %v691_v15 = vld [vmem:[#allocation7 + $0x220] sm:$0xff] }
  0x88   : > { %v737_v56 = vld [vmem:[#allocation9 + $0x110] sm:$0xff] }
  0xe4   : > { %v408_v17 = vpop.permute.xlu0 %407 }
  0xe5   : > { %vm409_vm1 = vcmp.eq.s32.totalorder %v3194_v16, %v408_v17  ;;  %v750_v17 = vld [vmem:[#allocation9 + $0x178] sm:$0xff]  ;;  %v696_v16 = vld [vmem:[#allocation7 + $0x248] sm:$0xff] }
  0xe6   : > { %2090 = vmatmul.mubr.msk.f32.vlgmr.msra.gmra.mrb[0].mxu0 %vm409_vm1, %v3002_v18  ;;  %2223 = vmatmul.mubr.msk.f32.vlgmr.msra.gmra.mrb[0].mxu1 %vm409_vm1, %v3002_v18  ;;  %v3254_v18 = vpack.c.bf16 %v750_v17, %v745_v14  ;;  %v3294_v14 = vpack.c.bf16 %v631_v11, %v626_v9  ;;  %v3306_v9 = vpack.c.bf16 %v630_v61, %v625_v60  ;;  %v717_v11 = vld [vmem:[#allocation9 + $0x70] sm:$0xff]  ;;  %v742_v60 = vld [vmem:[#allocation9 + $0x138] sm:$0xff]  ;;  %v655_v61 = vld [vmem:[#allocation7 + $0x100] sm:$0xff] }
  0xe7   : > { %847 = vmatprep.mubr.f32.mxu0 %v3643_v8  ;;  %918 = vmatprep.mubr.f32.mxu1 %v3643_v8 }
  0xe8   : > { %2424 = vmatpush1.bf16.msra.mxu0 %v3203_v27  ;;  %2456 = vmatpush1.bf16.msra.mxu1 %v3206_v30 }
  0xe9   : > { %2426 = vmatprep.subr.bf16.mxu0 %v3211_v34  ;;  %2458 = vmatprep.subr.bf16.mxu1 %v3213_v38 }
  0xec   : > { %2428 = vmatpush1.bf16.msra.mxu0 %v3215_v39  ;;  %2460 = vmatpush1.bf16.msra.mxu1 %v3218_v42 }
  0xed   : > { %2430 = vmatprep.subr.bf16.mxu0 %v3223_v46  ;;  %2462 = vmatprep.subr.bf16.mxu1 %v3225_v50 }
  0xf0   : > { %2432 = vmatpush1.bf16.msra.mxu0 %v3227_v51  ;;  %2464 = vmatpush1.bf16.msra.mxu1 %v3230_v54 }
  0xf1   : > { %2434 = vmatprep.subr.bf16.mxu0 %v3235_v58  ;;  %2466 = vmatprep.subr.bf16.mxu1 %v3237_v62 }
  0xf4   : > { %2436 = vmatpush1.bf16.msra.mxu0 %v3239_v63  ;;  %2468 = vmatpush1.bf16.msra.mxu1 %v3242_v3 }
  0xf5   : > { %2438 = vmatprep.subr.bf16.mxu0 %v3247_v7  ;;  %2470 = vmatprep.subr.bf16.mxu1 %v3249_v12 }
  0xf8   : > { %2440 = vmatpush1.bf16.msra.mxu0 %v3251_v13  ;;  %2472 = vmatpush1.bf16.msra.mxu1 %v3254_v18 }
  0xf9   : > { %2442 = vmatprep.subr.bf16.mxu0 %v3259_v23  ;;  %2474 = vmatprep.subr.bf16.mxu1 %v3261_v29 }
  0xfc   : > { %2444 = vmatpush1.bf16.msra.mxu0 %v3263_v31  ;;  %2476 = vmatpush1.bf16.msra.mxu1 %v3266_v35 }
  0xfd   : > { %2446 = vmatprep.subr.bf16.mxu0 %v3271_v41  ;;  %2478 = vmatprep.subr.bf16.mxu1 %v3273_v47 }
 0x100   : > { %2448 = vmatpush1.bf16.msra.mxu0 %v3275_v48  ;;  %2480 = vmatpush1.bf16.msra.mxu1 %v3278_v53 }
 0x101   : > { %2450 = vmatprep.subr.bf16.mxu0 %v3283_v59  ;;  %2482 = vmatprep.subr.bf16.mxu1 %v3285_v1 }
 0x104   : > { %2452 = vmatpush1.bf16.msra.mxu0 %v3287_v4  ;;  %2484 = vmatpush1.bf16.msra.mxu1 %v3290_v10 }
 0x105   : > { %2485 = vmatprep.subr.bf16.mxu0 %v2999_v2  ;;  %2542 = vmatprep.subr.bf16.mxu1 %v3294_v14 }
 0x1b9   : > { %v526_v17 = vpop.f32.mrb[0].mxu0  ;;  %v597_v19 = vpop.f32.mrb[0].mxu1 }
 0x1ba   : > { %v2092_v20 = vmul.f32 -1.442695, %v526_v17  ;;  %v528_v21 = vpop.f32.mrb[1].mxu0  ;;  %v2224_v24 = vpop.f32.mrb[1].mxu1  ;;  %v3308_v17 = vpack.c.bf16 %v641_v5, %v636_v0  ;;  %v660_v0 = vld [vmem:[#allocation7 + $0x128] sm:$0xff]  ;;  %v666_v5 = vld [vmem:[#allocation7 + $0x158] sm:$0xff] }
 0x1bb   : > { %v2093_v25 = vmul.f32 -1.442695, %v528_v21  ;;  %v640_v21 = vld [vmem:[#allocation7 + $0x88] sm:$0xff] }
 0x1bc   : > { %2831 = vpow2.f32 %v2092_v20  ;;  %v635_v20 = vld [vmem:[#allocation7 + $0x60] sm:$0xff] }
 0x1bd   : > { %2833 = vpow2.f32 %v2093_v25  ;;  %v646_v25 = vld [vmem:[#allocation7 + $0xb8] sm:$0xff] }
 0x1be   : > { %2835 = vtanh.f32 %v597_v19  ;;  %v722_v19 = vld [vmem:[#allocation9 + $0x98] sm:$0xff] }
 0x1c6   : > { %v2832_v28 = vpop.eup %2831 }
 0x1c7   : > { %v607_v32 = vadd.f32 1.0, %v2832_v28  ;;  %v2834_v33 = vpop.eup %2833  ;;  %v651_v28 = vld [vmem:[#allocation7 + $0xe0] sm:$0xff] }
 0x1c8   : > { %v2836_v36 = vpop.eup %2835  ;;  %v608_v43 = vadd.f32 1.0, %v2834_v33  ;;  %v3318_v33 = vpack.c.bf16 %v640_v21, %v635_v20  ;;  %v3341_v20 = vpack.c.bf16 %v660_v0, %v655_v61  ;;  %v747_v21 = vld [vmem:[#allocation9 + $0x160] sm:$0xff]  ;;  %v762_v61 = vld [vmem:[#allocation9 + $0x1d8] sm:$0xff] }
 0x1c9   : > { %2837 = vrcp.f32 %v607_v32  ;;  %v3316_v32 = vpack.c.bf16 %v722_v19, %v717_v11  ;;  %v671_v11 = vld [vmem:[#allocation7 + $0x180] sm:$0xff]  ;;  %v3339_v19 = vpack.c.bf16 %v742_v60, %v737_v56  ;;  %v757_v56 = vld [vmem:[#allocation9 + $0x1b0] sm:$0xff] }
 0x1ca   : > { %2839 = vrcp.f32 %v608_v43  ;;  %v645_v43 = vld [vmem:[#allocation7 + $0xb0] sm:$0xff]  ;;  %3684 = vst [vmem:[#allocation13_spill] sm:$0xff] %v3341_v20  ;;  %v675_v0 = vld [vmem:[#allocation7 + $0x1a0] sm:$0xff] }
 0x1d3   : > { %v2838_v37 = vpop.eup %2837 }
 0x1d4   : > { %v614_v44 = vmul.f32 %v2838_v37, %v2836_v36  ;;  %v2840_v49 = vpop.eup %2839  ;;  %v727_v36 = vld [vmem:[#allocation9 + $0xc0] sm:$0xff]  ;;  %v3322_v37 = vpack.c.bf16 %v651_v28, %v646_v25  ;;  %v3345_v25 = vpack.c.bf16 %v671_v11, %v666_v5  ;;  %v752_v28 = vld [vmem:[#allocation9 + $0x188] sm:$0xff]  ;;  %v686_v11 = vld [vmem:[#allocation7 + $0x1f8] sm:$0xff] }
 0x1d5   : > { %v680_v5 = vld [vmem:[#allocation7 + $0x1c8] sm:$0xff] }
 0x1d6   : > { %v616_v45 = vadd.f32 %v615_v40, %v614_v44  ;;  %v732_v40 = vld [vmem:[#allocation9 + $0xe8] sm:$0xff]  ;;  %v650_v44 = vld [vmem:[#allocation7 + $0xd8] sm:$0xff]  ;;  %3685 = vst [vmem:[#allocation14_spill] sm:$0xff] %v3345_v25 }
 0x1d8   : > { %2841 = vtanh.f32 %v616_v45  ;;  %620 = vst [vmem:[#allocation3 + $0x3] sm:$0xf] %v616_v45  ;;  %v656_v45 = vld [vmem:[#allocation7 + $0x108] sm:$0xff] }
 0x1e2   : > { %v2842_v52 = vpop.eup %2841 }
 0x1e3   : > { %v618_v55 = vmul.f32 %v2842_v52, %v2840_v49  ;;  %v661_v49 = vld [vmem:[#allocation7 + $0x130] sm:$0xff]  ;;  %v3329_v52 = vpack.c.bf16 %v732_v40, %v727_v36  ;;  %v670_v40 = vld [vmem:[#allocation7 + $0x178] sm:$0xff] }
 0x1e4   : > { %v3335_v57 = vpack.c.bf16 %v661_v49, %v656_v45  ;;  %v665_v36 = vld [vmem:[#allocation7 + $0x150] sm:$0xff]  ;;  %v3349_v45 = vpack.c.bf16 %v752_v28, %v747_v21  ;;  %v3359_v21 = vpack.c.bf16 %v762_v61, %v757_v56  ;;  %v3361_v28 = vpack.c.bf16 %v680_v5, %v675_v0  ;;  %v782_v5 = vld [vmem:[#allocation9 + $0x278] sm:$0xff] }
 0x1e5   : > { %619 = vst [vmem:[#allocation2 + $0x3] sm:$0xf] %v618_v55  ;;  %v3331_v55 = vpack.c.bf16 %v650_v44, %v645_v43  ;;  %v676_v43 = vld [vmem:[#allocation7 + $0x1a8] sm:$0xff]  ;;  %v681_v44 = vld [vmem:[#allocation7 + $0x1d0] sm:$0xff]  ;;  %v3351_v49 = vpack.c.bf16 %v670_v40, %v665_v36  ;;  %v767_v36 = vld [vmem:[#allocation9 + $0x200] sm:$0xff]  ;;  %v3365_v40 = vpack.c.bf16 %v691_v15, %v686_v11 }
 0x1e6   : > { %3686 = vst [vmem:[#allocation15_spill] sm:$0xff] %v3349_v45  ;;  %v3355_v60 = vpack.c.bf16 %v681_v44, %v676_v43  ;;  %3689 = vst [vmem:[#allocation18_spill] sm:$0xff] %v3359_v21  ;;  %v772_v43 = vld [vmem:[#allocation9 + $0x228] sm:$0xff]  ;;  %v685_v44 = vld [vmem:[#allocation7 + $0x1f0] sm:$0xff] }
 0x1e7   : > { %3687 = vst [vmem:[#allocation16_spill] sm:$0xff] %v3351_v49  ;;  %3690 = vst [vmem:[#allocation19_spill] sm:$0xff] %v3361_v28  ;;  %v3369_v56 = vpack.c.bf16 %v772_v43, %v767_v36  ;;  %v777_v0 = vld [vmem:[#allocation9 + $0x250] sm:$0xff]  ;;  %v695_v11 = vld [vmem:[#allocation7 + $0x240] sm:$0xff] }
 0x1e8   : > { %3688 = vst [vmem:[#allocation17_spill] sm:$0xff] %v3355_v60  ;;  %3691 = vst [vmem:[#allocation20_spill] sm:$0xff] %v3365_v40  ;;  %v3379_v36 = vpack.c.bf16 %v782_v5, %v777_v0  ;;  %v623_v43 = vld [vmem:[#allocation7] sm:$0xff]  ;;  %v633_v5 = vld [vmem:[#allocation7 + $0x50] sm:$0xff] }
 0x1e9   : > { %3692 = vst [vmem:[#allocation21_spill] sm:$0xff] %v3369_v56 }
 0x1ea   : > { %3695 = vst [vmem:[#allocation24_spill] sm:$0xff] %v3379_v36 }
 0x1ec   : > { %v3310_v24 = vld [vmem:[#allocation2 + $0x5] sm:$0x3] }
 0x1ed   : > { %848 = vmatmul.mubr.f32.vlgmr.msra.gmra.mrb[2].mxu0 %v3310_v24  ;;  %919 = vmatmul.mubr.f32.vlgmr.msra.gmra.mrb[2].mxu1 %v3310_v24 }
 0x1ee   : > { %2487 = vmatpush3.bf16.msra.mxu0 %v3304_v6  ;;  %2544 = vmatpush1.bf16.msra.mxu1 %v3306_v9 }
 0x1ef   : > { %2488 = vmatprep.subr.bf16.mxu0 %v2999_v2  ;;  %2546 = vmatprep.subr.bf16.mxu1 %v3308_v17 }
 0x1f0   : > { %2257 = vmatprep.mubr.msk.f32.mxu0 %vm3001_vm0, %v3643_v8  ;;  %1130 = vmatprep.mubr.f32.mxu1 %v3643_v8  ;;  %v690_v8 = vld [vmem:[#allocation7 + $0x218] sm:$0xff] }
 0x1f1   : > { %v3371_v61 = vpack.c.bf16 %v690_v8, %v685_v44  ;;  %v627_v44 = vld [vmem:[#allocation7 + $0x20] sm:$0xff] }
 0x1f2   : > { %2490 = vmatpush3.bf16.msra.mxu0 %v3316_v32  ;;  %2548 = vmatpush1.bf16.msra.mxu1 %v3318_v33 }
 0x1f3   : > { %2491 = vmatprep.subr.bf16.mxu0 %v2999_v2  ;;  %2550 = vmatprep.subr.bf16.mxu1 %v3322_v37  ;;  %3693 = vst [vmem:[#allocation22_spill] sm:$0xff] %v3371_v61 }
 0x1f6   : > { %2493 = vmatpush3.bf16.msra.mxu0 %v3329_v52  ;;  %2552 = vmatpush1.bf16.msra.mxu1 %v3331_v55 }
 0x1f7   : > { %2494 = vmatprep.subr.bf16.mxu0 %v2999_v2  ;;  %2554 = vmatprep.subr.bf16.mxu1 %v3335_v57 }
 0x1fa   : > { %2496 = vmatpush3.bf16.msra.mxu0 %v3339_v19  ;;  %2556 = vmatpush1.bf16.msra.mxu1 %v3341_v20  ;;  %v3704_v20 = vmov 0.0  }
 0x1fb   : > { %2497 = vmatprep.subr.bf16.mxu0 %v2999_v2  ;;  %2558 = vmatprep.subr.bf16.mxu1 %v3345_v25  ;;  %v701_v25 = vld [vmem:[#allocation7 + $0x270] sm:$0xff] }
 0x1fc   : > { %v3375_v15 = vpack.c.bf16 %v701_v25, %v696_v16  ;;  %v628_v25 = vld [vmem:[#allocation7 + $0x28] sm:$0xff] }
 0x1fd   : > { %v3389_v0 = vpack.c.bf16 %v628_v25, %v623_v43  ;;  %v648_v25 = vld [vmem:[#allocation7 + $0xc8] sm:$0xff] }
 0x1fe   : > { %2499 = vmatpush3.bf16.msra.mxu0 %v3349_v45  ;;  %2560 = vmatpush1.bf16.msra.mxu1 %v3351_v49  ;;  %3694 = vst [vmem:[#allocation23_spill] sm:$0xff] %v3375_v15  ;;  %v624_v49 = vld [vmem:[#allocation7 + $0x8] sm:$0xff]  ;;  %v629_v45 = vld [vmem:[#allocation7 + $0x30] sm:$0xff] }
 0x1ff   : > { %2500 = vmatprep.subr.bf16.mxu0 %v2999_v2  ;;  %2562 = vmatprep.subr.bf16.mxu1 %v3355_v60  ;;  %v700_v60 = vld [vmem:[#allocation7 + $0x268] sm:$0xff]  ;;  %v3385_v16 = vpack.c.bf16 %v629_v45, %v624_v49  ;;  %3698 = vst [vmem:[#allocation27_spill] sm:$0xff] %v3389_v0  ;;  %v638_v49 = vld [vmem:[#allocation7 + $0x78] sm:$0xff] }
 0x200   : > { %v3381_v8 = vpack.c.bf16 %v700_v60, %v695_v11  ;;  %v637_v11 = vld [vmem:[#allocation7 + $0x70] sm:$0xff] }
 0x201   : > { %3697 = vst [vmem:[#allocation26_spill] sm:$0xff] %v3385_v16 }
 0x202   : > { %2502 = vmatpush3.bf16.msra.mxu0 %v3359_v21  ;;  %2564 = vmatpush1.bf16.msra.mxu1 %v3361_v28  ;;  %3696 = vst [vmem:[#allocation25_spill] sm:$0xff] %v3381_v8  ;;  %v634_v28 = vld [vmem:[#allocation7 + $0x58] sm:$0xff]  ;;  %v639_v21 = vld [vmem:[#allocation7 + $0x80] sm:$0xff] }
 0x203   : > { %2503 = vmatprep.subr.bf16.mxu0 %v2999_v2  ;;  %2566 = vmatprep.subr.bf16.mxu1 %v3365_v40  ;;  %v632_v40 = vld [vmem:[#allocation7 + $0x48] sm:$0xff]  ;;  %v3395_v45 = vpack.c.bf16 %v639_v21, %v634_v28  ;;  %v643_v21 = vld [vmem:[#allocation7 + $0xa0] sm:$0xff] }
 0x204   : > { %v3391_v60 = vpack.c.bf16 %v632_v40, %v627_v44  ;;  %v3403_v40 = vpack.c.bf16 %v638_v49, %v633_v5  ;;  %v647_v44 = vld [vmem:[#allocation7 + $0xc0] sm:$0xff]  ;;  %v658_v49 = vld [vmem:[#allocation7 + $0x118] sm:$0xff] }
 0x205   : > { %3700 = vst [vmem:[#allocation29_spill] sm:$0xff] %v3395_v45 }
 0x206   : > { %2505 = vmatpush3.bf16.msra.mxu0 %v3369_v56  ;;  %2568 = vmatpush1.bf16.msra.mxu1 %v3371_v61  ;;  %3699 = vst [vmem:[#allocation28_spill] sm:$0xff] %v3391_v60  ;;  %v3397_v61 = vld [vmem:[#allocation2 + $0x3] sm:$0x3]  ;;  %v644_v56 = vld [vmem:[#allocation7 + $0xa8] sm:$0xff]  ;;  %3701 = vst [vmem:[#allocation30_spill] sm:$0xff] %v3403_v40 }
 0x207   : > { %2506 = vmatprep.subr.bf16.mxu0 %v2999_v2  ;;  %2570 = vmatprep.subr.bf16.mxu1 %v3375_v15  ;;  %v642_v15 = vld [vmem:[#allocation7 + $0x98] sm:$0xff] }
 0x208   : > { %v3405_v43 = vpack.c.bf16 %v642_v15, %v637_v11  ;;  %v3416_v15 = vpack.c.bf16 %v648_v25, %v643_v21  ;;  %v657_v11 = vld [vmem:[#allocation7 + $0x110] sm:$0xff] }
 0x20a   : > { %2508 = vmatpush3.bf16.msra.mxu0 %v3379_v36  ;;  %2572 = vmatpush1.bf16.msra.mxu1 %v3381_v8  ;;  %v649_v36 = vld [vmem:[#allocation7 + $0xd0] sm:$0xff]  ;;  %3702 = vst [vmem:[#allocation31_spill] sm:$0xff] %v3405_v43  ;;  %v659_v8 = vld [vmem:[#allocation7 + $0x120] sm:$0xff]  ;;  %3705 = vst [vmem:[#allocation33_spill] sm:$0xff] %v3416_v15 }
 0x20b   : > { %2510 = vmatprep.subr.bf16.mxu0 %v3385_v16  ;;  %2573 = vmatprep.subr.bf16.mxu1 %v2999_v2  ;;  %v3409_v28 = vpack.c.bf16 %v649_v36, %v644_v56  ;;  %v654_v16 = vld [vmem:[#allocation7 + $0xf8] sm:$0xff]  ;;  %v653_v56 = vld [vmem:[#allocation7 + $0xf0] sm:$0xff] }
 0x20c   : > { %v3422_v36 = vpack.c.bf16 %v659_v8, %v654_v16  ;;  %v3426_v21 = vpack.c.bf16 %v658_v49, %v653_v56  ;;  %v668_v16 = vld [vmem:[#allocation7 + $0x168] sm:$0xff]  ;;  %v673_v49 = vld [vmem:[#allocation7 + $0x190] sm:$0xff] }
 0x20d   : > { %2258 = vmatmul.mubr.f32.vlgmr.msra.gmra.mrb[4].mxu0 %v3310_v24  ;;  %1131 = vmatmul.mubr.f32.vlgmr.msra.gmra.mrb[2].mxu1 %v3397_v61  ;;  %3703 = vst [vmem:[#allocation32_spill] sm:$0xff] %v3409_v28  ;;  %v652_v24 = vld [vmem:[#allocation7 + $0xe8] sm:$0xff] }
 0x20e   : > { %2512 = vmatpush1.bf16.msra.mxu0 %v3389_v0  ;;  %2575 = vmatpush3.bf16.msra.mxu1 %v3391_v60  ;;  %v3418_v5 = vpack.c.bf16 %v652_v24, %v647_v44  ;;  %3707 = vst [vmem:[#allocation35_spill] sm:$0xff] %v3422_v36  ;;  %v664_v60 = vld [vmem:[#allocation7 + $0x148] sm:$0xff]  ;;  %v669_v0 = vld [vmem:[#allocation7 + $0x170] sm:$0xff]  ;;  %3708 = vst [vmem:[#allocation36_spill] sm:$0xff] %v3426_v21 }
 0x20f   : > { %2514 = vmatprep.subr.bf16.mxu0 %v3395_v45  ;;  %2576 = vmatprep.subr.bf16.mxu1 %v2999_v2  ;;  %v662_v45 = vld [vmem:[#allocation7 + $0x138] sm:$0xff]  ;;  %v663_v44 = vld [vmem:[#allocation7 + $0x140] sm:$0xff]  ;;  %v3432_v8 = vpack.c.bf16 %v669_v0, %v664_v60 }
 0x210   : > { %1059 = vmatprep.mubr.f32.mxu0 %v3704_v20  ;;  %2292 = vmatprep.mubr.msk.f32.mxu1 %vm3001_vm0, %v3704_v20  ;;  %3706 = vst [vmem:[#allocation34_spill] sm:$0xff] %v3418_v5  ;;  %v3428_v25 = vpack.c.bf16 %v662_v45, %v657_v11  ;;  %v667_v24 = vld [vmem:[#allocation7 + $0x160] sm:$0xff]  ;;  %v3436_v56 = vpack.c.bf16 %v668_v16, %v663_v44  ;;  %v678_v60 = vld [vmem:[#allocation7 + $0x1b8] sm:$0xff]  ;;  %v677_v11 = vld [vmem:[#allocation7 + $0x1b0] sm:$0xff] }
 0x211   : > { %3710 = vst [vmem:[#allocation38_spill] sm:$0xff] %v3432_v8  ;;  %v3446_v44 = vpack.c.bf16 %v678_v60, %v673_v49  ;;  %v683_v16 = vld [vmem:[#allocation7 + $0x1e0] sm:$0xff]  ;;  %v693_v60 = vld [vmem:[#allocation7 + $0x230] sm:$0xff] }
 0x212   : > { %2516 = vmatpush1.bf16.msra.mxu0 %v3403_v40  ;;  %2578 = vmatpush3.bf16.msra.mxu1 %v3405_v43  ;;  %3709 = vst [vmem:[#allocation37_spill] sm:$0xff] %v3428_v25  ;;  %v674_v43 = vld [vmem:[#allocation7 + $0x198] sm:$0xff]  ;;  %v679_v40 = vld [vmem:[#allocation7 + $0x1c0] sm:$0xff] }
 0x213   : > { %2518 = vmatprep.subr.bf16.mxu0 %v3409_v28  ;;  %2579 = vmatprep.subr.bf16.mxu1 %v2999_v2  ;;  %v672_v28 = vld [vmem:[#allocation7 + $0x188] sm:$0xff]  ;;  %v3442_v0 = vpack.c.bf16 %v679_v40, %v674_v43  ;;  %3712 = vst [vmem:[#allocation40_spill] sm:$0xff] %v3446_v44 }
 0x214   : > { %v3438_v45 = vpack.c.bf16 %v672_v28, %v667_v24  ;;  %v688_v43 = vld [vmem:[#allocation7 + $0x208] sm:$0xff]  ;;  %v687_v24 = vld [vmem:[#allocation7 + $0x200] sm:$0xff] }
 0x215   : > { %3711 = vst [vmem:[#allocation39_spill] sm:$0xff] %v3442_v0  ;;  %v3456_v49 = vpack.c.bf16 %v688_v43, %v683_v16 }
 0x216   : > { %2520 = vmatpush1.bf16.msra.mxu0 %v3416_v15  ;;  %2581 = vmatpush3.bf16.msra.mxu1 %v3418_v5  ;;  %v684_v5 = vld [vmem:[#allocation7 + $0x1e8] sm:$0xff]  ;;  %v689_v15 = vld [vmem:[#allocation7 + $0x210] sm:$0xff] }
 0x217   : > { %2522 = vmatprep.subr.bf16.mxu0 %v3422_v36  ;;  %2582 = vmatprep.subr.bf16.mxu1 %v2999_v2  ;;  %v682_v36 = vld [vmem:[#allocation7 + $0x1d8] sm:$0xff]  ;;  %v3452_v40 = vpack.c.bf16 %v689_v15, %v684_v5 }
 0x218   : > { %v3448_v28 = vpack.c.bf16 %v682_v36, %v677_v11  ;;  %v698_v5 = vld [vmem:[#allocation7 + $0x258] sm:$0xff]  ;;  %v697_v11 = vld [vmem:[#allocation7 + $0x250] sm:$0xff] }
 0x21a   : > { %2524 = vmatpush1.bf16.msra.mxu0 %v3426_v21  ;;  %2584 = vmatpush3.bf16.msra.mxu1 %v3428_v25  ;;  %v694_v25 = vld [vmem:[#allocation7 + $0x238] sm:$0xff]  ;;  %v699_v21 = vld [vmem:[#allocation7 + $0x260] sm:$0xff] }
 0x21b   : > { %2526 = vmatprep.subr.bf16.mxu0 %v3432_v8  ;;  %2585 = vmatprep.subr.bf16.mxu1 %v2999_v2  ;;  %v692_v8 = vld [vmem:[#allocation7 + $0x228] sm:$0xff]  ;;  %v3462_v15 = vpack.c.bf16 %v699_v21, %v694_v25 }
 0x21c   : > { %v3458_v36 = vpack.c.bf16 %v692_v8, %v687_v24 }
 0x21e   : > { %2528 = vmatpush1.bf16.msra.mxu0 %v3436_v56  ;;  %2587 = vmatpush3.bf16.msra.mxu1 %v3438_v45 }
 0x21f   : > { %2530 = vmatprep.subr.bf16.mxu0 %v3442_v0  ;;  %2588 = vmatprep.subr.bf16.mxu1 %v2999_v2  ;;  %v702_v0 = vld [vmem:[#allocation7 + $0x278] sm:$0xff] }
 0x220   : > { %v3468_v16 = vpack.c.bf16 %v702_v0, %v697_v11 }
 0x222   : > { %2532 = vmatpush1.bf16.msra.mxu0 %v3446_v44  ;;  %2590 = vmatpush3.bf16.msra.mxu1 %v3448_v28  ;;  %v3466_v44 = vpack.c.bf16 %v698_v5, %v693_v60  ;;  %v1264_v5 = vld [vmem:[#allocation3 + $0x3] sm:$0x3] }
 0x223   : > { %2534 = vmatprep.subr.bf16.mxu0 %v3452_v40  ;;  %2591 = vmatprep.subr.bf16.mxu1 %v2999_v2 }
 0x226   : > { %2536 = vmatpush1.bf16.msra.mxu0 %v3456_v49  ;;  %2593 = vmatpush3.bf16.msra.mxu1 %v3458_v36 }
 0x227   : > { %2538 = vmatprep.subr.bf16.mxu0 %v3462_v15  ;;  %2594 = vmatprep.subr.bf16.mxu1 %v2999_v2 }
 0x22a   : > { %2540 = vmatpush1.bf16.msra.mxu0 %v3466_v44  ;;  %2596 = vmatpush3.bf16.msra.mxu1 %v3468_v16 }
 0x22b   : > { %2598 = vmatprep.subr.bf16.mxu0 %v3199_v22  ;;  %2630 = vmatprep.subr.bf16.mxu1 %v3201_v26  ;;  %v3713_v22 = vlaneseq }
 0x22d   : > { %1060 = vmatmul.mubr.f32.vlgmr.msra.gmra.mrb[2].mxu0 %v3397_v61  ;;  %2293 = vmatmul.mubr.f32.vlgmr.msra.gmra.mrb[4].mxu1 %v3397_v61  ;;  %v3513_v26 = vshrl.u32 %v3713_v22, 7 }
 0x22e   : > { %2600 = vmatpush1.bf16.msra.mxu0 %v3203_v27  ;;  %2632 = vmatpush1.bf16.msra.mxu1 %v3206_v30 }
 0x22f   : > { %2602 = vmatprep.subr.bf16.mxu0 %v3211_v34  ;;  %2634 = vmatprep.subr.bf16.mxu1 %v3213_v38 }
 0x230   : > { %1501 = vmatprep.mubr.f32.mxu0 %v3704_v20  ;;  %1572 = vmatprep.mubr.f32.mxu1 %v3704_v20 }
 0x232   : > { %2604 = vmatpush1.bf16.msra.mxu0 %v3215_v39  ;;  %2636 = vmatpush1.bf16.msra.mxu1 %v3218_v42  ;;  %v1219_v39 = vsub.s32 2, %v3513_v26  ;;  %v1207_v42 = vld [vmem:[%s3636_s6] sm:$0x1f] }
 0x233   : > { %2606 = vmatprep.subr.bf16.mxu0 %v3223_v46  ;;  %2638 = vmatprep.subr.bf16.mxu1 %v3225_v50 }
 0x234   : > { %v1220_v46 = vrot.slane %v1207_v42, %v1219_v39 }
 0x236   : > { %2608 = vmatpush1.bf16.msra.mxu0 %v3227_v51  ;;  %2640 = vmatpush1.bf16.msra.mxu1 %v3230_v54  ;;  %v1211_v54 = vsub.s32 0, %v3513_v26 }
 0x237   : > { %2610 = vmatprep.subr.bf16.mxu0 %v3235_v58  ;;  %2642 = vmatprep.subr.bf16.mxu1 %v3237_v62  ;;  %v1215_v58 = vsub.s32 1, %v3513_v26  ;;  %v1227_v62 = vsub.s32 4, %v3513_v26 }
 0x23a   : > { %2612 = vmatpush1.bf16.msra.mxu0 %v3239_v63  ;;  %2644 = vmatpush1.bf16.msra.mxu1 %v3242_v3  ;;  %v1212_v3 = vrot.slane %v1207_v42, %v1211_v54 }
 0x23b   : > { %2614 = vmatprep.subr.bf16.mxu0 %v3247_v7  ;;  %2646 = vmatprep.subr.bf16.mxu1 %v3249_v12  ;;  %v1216_v7 = vrot.slane %v1207_v42, %v1215_v58  ;;  %v1228_v12 = vrot.slane %v1207_v42, %v1227_v62 }
 0x23e   : > { %2616 = vmatpush1.bf16.msra.mxu0 %v3251_v13  ;;  %2648 = vmatpush1.bf16.msra.mxu1 %v3254_v18 }
 0x23f   : > { %2618 = vmatprep.subr.bf16.mxu0 %v3259_v23  ;;  %2650 = vmatprep.subr.bf16.mxu1 %v3261_v29 }
 0x242   : > { %2620 = vmatpush1.bf16.msra.mxu0 %v3263_v31  ;;  %2652 = vmatpush1.bf16.msra.mxu1 %v3266_v35 }
 0x243   : > { %2622 = vmatprep.subr.bf16.mxu0 %v3271_v41  ;;  %2654 = vmatprep.subr.bf16.mxu1 %v3273_v47 }
 0x246   : > { %2624 = vmatpush1.bf16.msra.mxu0 %v3275_v48  ;;  %2656 = vmatpush1.bf16.msra.mxu1 %v3278_v53  ;;  %v1223_v48 = vsub.s32 3, %v3513_v26 }
 0x247   : > { %2626 = vmatprep.subr.bf16.mxu0 %v3283_v59  ;;  %2658 = vmatprep.subr.bf16.mxu1 %v3285_v1 }
 0x24a   : > { %2628 = vmatpush1.bf16.msra.mxu0 %v3287_v4  ;;  %2660 = vmatpush1.bf16.msra.mxu1 %v3290_v10  ;;  %v1224_v4 = vrot.slane %v1207_v42, %v1223_v48 }
 0x24b   : > { %2661 = vmatprep.subr.bf16.mxu0 %v2999_v2  ;;  %2718 = vmatprep.subr.bf16.mxu1 %v3294_v14 }
 0x2e0   : > { %v991_v27 = vpop.f32.mrb[4].mxu0  ;;  %v1132_v30 = vpop.f32.mrb[2].mxu1 }
 0x2e1   : > { %v2259_v34 = vpop.f32.mrb[5].mxu0  ;;  %v1134_v38 = vpop.f32.mrb[3].mxu1  ;;  %v1236_v50 = vadd.f32 %v1220_v46, %v1132_v30  ;;  %v1266_v30 = vld [vmem:[#allocation3 + $0x5] sm:$0x3] }
 0x2e2   : > { %v1237_v10 = vadd.f32 %v1224_v4, %v1134_v38  ;;  %v3736_v4 = vld [vmem:[#allocation35_spill] sm:$0xff] }
 0x2e3   : > { %v2096_v51 = vmul.f32 -1.442695, %v1236_v50 }
 0x2e4   : > { %v2097_v21 = vmul.f32 -1.442695, %v1237_v10  ;;  %v3737_v10 = vld [vmem:[#allocation36_spill] sm:$0xff] }
 0x2e5   : > { %2843 = vpow2.f32 %v2096_v51 }
 0x2ef   : > { %v2844_v63 = vpop.eup %2843 }
 0x2f0   : > { %v1253_v13 = vadd.f32 1.0, %v2844_v63 }
 0x2f2   : > { %2845 = vrcp.f32 %v1253_v13  ;;  %v3726_v13 = vld [vmem:[#allocation25_spill] sm:$0xff] }
 0x2fc   : > { %v2846_v14 = vpop.eup %2845 }
 0x300   : > { %v1061_v18 = vpop.f32.mrb[2].mxu0  ;;  %v1203_v23 = vpop.f32.mrb[4].mxu1 }
 0x301   : > { %v1234_v29 = vadd.f32 %v1212_v3, %v1061_v18  ;;  %v1204_v31 = vadd.f32 %v1203_v23, %v991_v27  ;;  %v1063_v35 = vpop.f32.mrb[3].mxu0  ;;  %v2294_v41 = vpop.f32.mrb[5].mxu1  ;;  %v3727_v18 = vld [vmem:[#allocation26_spill] sm:$0xff] }
 0x302   : > { %v1235_v47 = vadd.f32 %v1216_v7, %v1063_v35  ;;  %v3724_v7 = vld [vmem:[#allocation23_spill] sm:$0xff]  ;;  %v3730_v35 = vld [vmem:[#allocation29_spill] sm:$0xff]  ;;  %v3731_v41 = vld [vmem:[#allocation30_spill] sm:$0xff] }
 0x303   : > { %v2094_v53 = vmul.f32 -1.442695, %v1234_v29  ;;  %v1238_v59 = vadd.f32 %v1228_v12, %v1204_v31  ;;  %v3725_v12 = vld [vmem:[#allocation24_spill] sm:$0xff]  ;;  %v3728_v29 = vld [vmem:[#allocation27_spill] sm:$0xff] }
 0x304   : > { %v2095_v1 = vmul.f32 -1.442695, %v1235_v47  ;;  %v3729_v31 = vld [vmem:[#allocation28_spill] sm:$0xff]  ;;  %v3732_v47 = vld [vmem:[#allocation31_spill] sm:$0xff] }
 0x305   : > { %2847 = vpow2.f32 %v2094_v53  ;;  %v3733_v53 = vld [vmem:[#allocation32_spill] sm:$0xff] }
 0x306   : > { %2849 = vtanh.f32 %v1238_v59  ;;  %v3734_v59 = vld [vmem:[#allocation33_spill] sm:$0xff] }
 0x307   : > { %2851 = vpow2.f32 %v2095_v1  ;;  %v3735_v1 = vld [vmem:[#allocation34_spill] sm:$0xff] }
 0x30f   : > { %v2848_v61 = vpop.eup %2847 }
 0x310   : > { %v2850_v25 = vpop.eup %2849  ;;  %v1251_v8 = vadd.f32 1.0, %v2848_v61  ;;  %v3740_v61 = vld [vmem:[#allocation39_spill] sm:$0xff] }
 0x311   : > { %v2852_v0 = vpop.eup %2851  ;;  %v1269_v43 = vmul.f32 %v2850_v25, %v2846_v14  ;;  %v3738_v14 = vld [vmem:[#allocation37_spill] sm:$0xff] }
 0x312   : > { %2853 = vrcp.f32 %v1251_v8  ;;  %v1252_v24 = vadd.f32 1.0, %v2852_v0 }
 0x313   : > { %2855 = vpow2.f32 %v2097_v21  ;;  %v3741_v21 = vld [vmem:[#allocation40_spill] sm:$0xff] }
 0x314   : > { %2857 = vrcp.f32 %v1252_v24 }
 0x31c   : > { %v2854_v60 = vpop.eup %2853 }
 0x31d   : > { %v2856_v11 = vpop.eup %2855  ;;  %v1265_v22 = vmul.f32 %v2854_v60, %v1264_v5 }
 0x31e   : > { %v2858_v27 = vpop.eup %2857  ;;  %v1254_v42 = vadd.f32 1.0, %v2856_v11 }
 0x31f   : > { %v1267_v34 = vmul.f32 %v2858_v27, %v1266_v30 }
 0x320   : > { %2859 = vrcp.f32 %v1254_v42 }
 0x321   : > { %v1268_v38 = vadd.f32 %v1267_v34, %v1265_v22 }
 0x323   : > { %v1270_v46 = vadd.f32 %v1269_v43, %v1268_v38 }
 0x325   : > { %2861 = vtanh.f32 %v1270_v46  ;;  %1274 = vst [vmem:[#allocation3 + $0x1] sm:$0x3] %v1270_v46 }
 0x32a   : > { %v2860_v50 = vpop.eup %2859 }
 0x32c   : > { %v1920_v26 = vld [vmem:[#allocation3 + $0x2] sm:$0x1] }
 0x32f   : > { %v2862_v51 = vpop.eup %2861 }
 0x330   : > { %v1272_v63 = vmul.f32 %v2862_v51, %v2860_v50 }
 0x332   : > { %1273 = vst [vmem:[#allocation2 + $0x1] sm:$0x3] %v1272_v63 }
 0x339   : > { %v1276_v3 = vld [vmem:[#allocation2 + $0x2] sm:$0x1]  ;;  %v1275_v23 = vld [vmem:[#allocation2 + $0x1] sm:$0x1] }
 0x33a   : > { %1502 = vmatmul.mubr.f32.vlgmr.msra.gmra.mrb[6].mxu0 %v1276_v3  ;;  %1573 = vmatmul.mubr.f32.vlgmr.msra.gmra.mrb[6].mxu1 %v1276_v3 }
 0x33b   : > { %2663 = vmatpush3.bf16.msra.mxu0 %v3304_v6  ;;  %2720 = vmatpush1.bf16.msra.mxu1 %v3306_v9  ;;  %v3714_v6 = vld [vmem:[#allocation13_spill] sm:$0xff]  ;;  %v3715_v9 = vld [vmem:[#allocation14_spill] sm:$0xff] }
 0x33c   : > { %2664 = vmatprep.subr.bf16.mxu0 %v2999_v2  ;;  %2722 = vmatprep.subr.bf16.mxu1 %v3308_v17  ;;  %v3716_v17 = vld [vmem:[#allocation15_spill] sm:$0xff] }
 0x33d   : > { %2327 = vmatprep.mubr.msk.f32.mxu0 %vm3001_vm0, %v3704_v20  ;;  %1784 = vmatprep.mubr.f32.mxu1 %v3704_v20 }
 0x33f   : > { %2666 = vmatpush3.bf16.msra.mxu0 %v3316_v32  ;;  %2724 = vmatpush1.bf16.msra.mxu1 %v3318_v33  ;;  %v3717_v32 = vld [vmem:[#allocation16_spill] sm:$0xff]  ;;  %v3718_v33 = vld [vmem:[#allocation17_spill] sm:$0xff] }
 0x340   : > { %2667 = vmatprep.subr.bf16.mxu0 %v2999_v2  ;;  %2726 = vmatprep.subr.bf16.mxu1 %v3322_v37  ;;  %v3719_v37 = vld [vmem:[#allocation18_spill] sm:$0xff] }
 0x343   : > { %2669 = vmatpush3.bf16.msra.mxu0 %v3329_v52  ;;  %2728 = vmatpush1.bf16.msra.mxu1 %v3331_v55  ;;  %v3720_v52 = vld [vmem:[#allocation19_spill] sm:$0xff]  ;;  %v3721_v55 = vld [vmem:[#allocation20_spill] sm:$0xff] }
 0x344   : > { %2670 = vmatprep.subr.bf16.mxu0 %v2999_v2  ;;  %2730 = vmatprep.subr.bf16.mxu1 %v3335_v57  ;;  %v3722_v57 = vld [vmem:[#allocation21_spill] sm:$0xff] }
 0x347   : > { %2672 = vmatpush3.bf16.msra.mxu0 %v3339_v19  ;;  %2732 = vmatpush1.bf16.msra.mxu1 %v3714_v6  ;;  %v3723_v19 = vld [vmem:[#allocation22_spill] sm:$0xff] }
 0x348   : > { %2673 = vmatprep.subr.bf16.mxu0 %v2999_v2  ;;  %2734 = vmatprep.subr.bf16.mxu1 %v3715_v9  ;;  %v1918_v9 = vld [vmem:[#allocation3 + $0x1] sm:$0x1] }
 0x34b   : > { %2675 = vmatpush3.bf16.msra.mxu0 %v3716_v17  ;;  %2736 = vmatpush1.bf16.msra.mxu1 %v3717_v32 }
 0x34c   : > { %2676 = vmatprep.subr.bf16.mxu0 %v2999_v2  ;;  %2738 = vmatprep.subr.bf16.mxu1 %v3718_v33 }
 0x34f   : > { %2678 = vmatpush3.bf16.msra.mxu0 %v3719_v37  ;;  %2740 = vmatpush1.bf16.msra.mxu1 %v3720_v52 }
 0x350   : > { %2679 = vmatprep.subr.bf16.mxu0 %v2999_v2  ;;  %2742 = vmatprep.subr.bf16.mxu1 %v3721_v55 }
 0x353   : > { %2681 = vmatpush3.bf16.msra.mxu0 %v3722_v57  ;;  %2744 = vmatpush1.bf16.msra.mxu1 %v3723_v19 }
 0x354   : > { %2682 = vmatprep.subr.bf16.mxu0 %v2999_v2  ;;  %2746 = vmatprep.subr.bf16.mxu1 %v3724_v7 }
 0x357   : > { %2684 = vmatpush3.bf16.msra.mxu0 %v3725_v12  ;;  %2748 = vmatpush1.bf16.msra.mxu1 %v3726_v13  ;;  %v1930_v12 = vld [vmem:[%s3637_s7] sm:$0x1] }
 0x358   : > { %2686 = vmatprep.subr.bf16.mxu0 %v3727_v18  ;;  %2749 = vmatprep.subr.bf16.mxu1 %v2999_v2 }
 0x35a   : > { %2328 = vmatmul.mubr.f32.vlgmr.msra.gmra.mrb[8].mxu0 %v1276_v3  ;;  %1785 = vmatmul.mubr.f32.vlgmr.msra.gmra.mrb[6].mxu1 %v1275_v23 }
 0x35b   : > { %2688 = vmatpush1.bf16.msra.mxu0 %v3728_v29  ;;  %2751 = vmatpush3.bf16.msra.mxu1 %v3729_v31  ;;  %v1936_v29 = vld [vmem:[#allocation4] sm:$0x1] }
 0x35c   : > { %2690 = vmatprep.subr.bf16.mxu0 %v3730_v35  ;;  %2752 = vmatprep.subr.bf16.mxu1 %v2999_v2 }
 0x35d   : > { %1713 = vmatprep.mubr.f32.mxu0 %v3704_v20  ;;  %2362 = vmatprep.mubr.msk.f32.mxu1 %vm3001_vm0, %v3704_v20  ;;  %v3739_v20 = vld [vmem:[#allocation38_spill] sm:$0xff] }
 0x35f   : > { %2692 = vmatpush1.bf16.msra.mxu0 %v3731_v41  ;;  %2754 = vmatpush3.bf16.msra.mxu1 %v3732_v47 }
 0x360   : > { %2694 = vmatprep.subr.bf16.mxu0 %v3733_v53  ;;  %2755 = vmatprep.subr.bf16.mxu1 %v2999_v2 }
 0x363   : > { %2696 = vmatpush1.bf16.msra.mxu0 %v3734_v59  ;;  %2757 = vmatpush3.bf16.msra.mxu1 %v3735_v1 }
 0x364   : > { %2698 = vmatprep.subr.bf16.mxu0 %v3736_v4  ;;  %2758 = vmatprep.subr.bf16.mxu1 %v2999_v2 }
 0x367   : > { %2700 = vmatpush1.bf16.msra.mxu0 %v3737_v10  ;;  %2760 = vmatpush3.bf16.msra.mxu1 %v3738_v14 }
 0x368   : > { %2702 = vmatprep.subr.bf16.mxu0 %v3739_v20  ;;  %2761 = vmatprep.subr.bf16.mxu1 %v2999_v2 }
 0x36b   : > { %2704 = vmatpush1.bf16.msra.mxu0 %v3436_v56  ;;  %2763 = vmatpush3.bf16.msra.mxu1 %v3438_v45 }
 0x36c   : > { %2706 = vmatprep.subr.bf16.mxu0 %v3740_v61  ;;  %2764 = vmatprep.subr.bf16.mxu1 %v2999_v2  ;;  %v1944_v61 = vld [vmem:[%s395_s22] sm:$0x1] }
 0x36f   : > { %2708 = vmatpush1.bf16.msra.mxu0 %v3741_v21  ;;  %2766 = vmatpush3.bf16.msra.mxu1 %v3448_v28 }
 0x370   : > { %2710 = vmatprep.subr.bf16.mxu0 %v3452_v40  ;;  %2767 = vmatprep.subr.bf16.mxu1 %v2999_v2 }
 0x373   : > { %2712 = vmatpush1.bf16.msra.mxu0 %v3456_v49  ;;  %2769 = vmatpush3.bf16.msra.mxu1 %v3458_v36  ;;  %v1861_v49 = vld [vmem:[%s3636_s6] sm:$0x1f] }
 0x374   : > { %2714 = vmatprep.subr.bf16.mxu0 %v3462_v15  ;;  %2770 = vmatprep.subr.bf16.mxu1 %v2999_v2  ;;  %v1874_v36 = vrot.slane %v1861_v49, %v1219_v39  ;;  %v1882_v8 = vrot.slane %v1861_v49, %v1227_v62 }
 0x377   : > { %2716 = vmatpush1.bf16.msra.mxu0 %v3466_v44  ;;  %2772 = vmatpush3.bf16.msra.mxu1 %v3468_v16  ;;  %v1866_v44 = vrot.slane %v1861_v49, %v1211_v54  ;;  %v1870_v16 = vrot.slane %v1861_v49, %v1215_v58  ;;  %v1878_v54 = vrot.slane %v1861_v49, %v1223_v48 }
 0x37a   : > { %1714 = vmatmul.mubr.f32.vlgmr.msra.gmra.mrb[6].mxu0 %v1275_v23  ;;  %2363 = vmatmul.mubr.f32.vlgmr.msra.gmra.mrb[8].mxu1 %v1275_v23 }
 0x42d   : > { %v1645_v56 = vpop.f32.mrb[8].mxu0  ;;  %v1786_v45 = vpop.f32.mrb[6].mxu1 }
 0x42e   : > { %v2329_v28 = vpop.f32.mrb[9].mxu0  ;;  %v1788_v40 = vpop.f32.mrb[7].mxu1  ;;  %v1890_v15 = vadd.f32 %v1874_v36, %v1786_v45 }
 0x42f   : > { %v1891_v58 = vadd.f32 %v1878_v54, %v1788_v40 }
 0x430   : > { %v2100_v25 = vmul.f32 -1.442695, %v1890_v15 }
 0x431   : > { %v2101_v38 = vmul.f32 -1.442695, %v1891_v58 }
 0x432   : > { %2863 = vpow2.f32 %v2100_v25 }
 0x43c   : > { %v2864_v2 = vpop.eup %2863 }
 0x43d   : > { %v1907_v0 = vadd.f32 1.0, %v2864_v2 }
 0x43f   : > { %2865 = vrcp.f32 %v1907_v0 }
 0x449   : > { %v2866_v62 = vpop.eup %2865 }
 0x44d   : > { %v1715_v43 = vpop.f32.mrb[6].mxu0  ;;  %v1857_v24 = vpop.f32.mrb[8].mxu1 }
 0x44e   : > { %v1888_v60 = vadd.f32 %v1866_v44, %v1715_v43  ;;  %v1858_v5 = vadd.f32 %v1857_v24, %v1645_v56  ;;  %v1717_v11 = vpop.f32.mrb[7].mxu0  ;;  %v2364_v39 = vpop.f32.mrb[9].mxu1 }
 0x44f   : > { %v1889_v22 = vadd.f32 %v1870_v16, %v1717_v11 }
 0x450   : > { %v2098_v27 = vmul.f32 -1.442695, %v1888_v60  ;;  %v1892_v30 = vadd.f32 %v1882_v8, %v1858_v5  ;;  %v3742_v8 = vld [vmem:[#allocation12_spill] sm:$0xff] }
 0x451   : > { %v2099_v34 = vmul.f32 -1.442695, %v1889_v22  ;;  %vm1963_vm4 = vcmp.eq.s32.totalorder %v3742_v8, 1  ;;  %vm1962_vm5 = vcmp.eq.s32.totalorder %v3742_v8, 0 }
 0x452   : > { %2867 = vpow2.f32 %v2098_v27 }
 0x453   : > { %2869 = vtanh.f32 %v1892_v30 }
 0x454   : > { %2871 = vpow2.f32 %v2099_v34 }
 0x45c   : > { %v2868_v42 = vpop.eup %2867 }
 0x45d   : > { %v2870_v46 = vpop.eup %2869  ;;  %v1905_v50 = vadd.f32 1.0, %v2868_v42 }
 0x45e   : > { %v2872_v51 = vpop.eup %2871  ;;  %v1923_v63 = vmul.f32 %v2870_v46, %v2866_v62 }
 0x45f   : > { %2873 = vrcp.f32 %v1905_v50  ;;  %v1906_v3 = vadd.f32 1.0, %v2872_v51 }
 0x460   : > { %2875 = vpow2.f32 %v2101_v38 }
 0x461   : > { %2877 = vrcp.f32 %v1906_v3 }
 0x469   : > { %v2874_v6 = vpop.eup %2873 }
 0x46a   : > { %v2876_v17 = vpop.eup %2875  ;;  %v1919_v32 = vmul.f32 %v2874_v6, %v1918_v9 }
 0x46b   : > { %v2878_v33 = vpop.eup %2877  ;;  %v1908_v37 = vadd.f32 1.0, %v2876_v17 }
 0x46c   : > { %v1921_v48 = vmul.f32 %v2878_v33, %v1920_v26 }
 0x46d   : > { %2879 = vrcp.f32 %v1908_v37 }
 0x46e   : > { %v1922_v52 = vadd.f32 %v1921_v48, %v1919_v32 }
 0x470   : > { %v1924_v55 = vadd.f32 %v1923_v63, %v1922_v52 }
 0x472   : > { %2881 = vtanh.f32 %v1924_v55 }
 0x477   : > { %v2880_v57 = vpop.eup %2879 }
 0x47c   : > { %v2882_v19 = vpop.eup %2881 }
 0x47d   : > { %v1926_v7 = vmul.f32 %v2882_v19, %v2880_v57 }
 0x47f   : > { %1927 = vst [vmem:[#allocation2] sm:$0x1] %v1926_v7 }
 0x486   : > { %v1929_v13 = vld [vmem:[#allocation2] sm:$0x1] }
 0x487   : > { %v1931_v18 = vmul.f32 %v1930_v12, %v1929_v13 }
 0x489   : > { %v1933_v23 = vsel %vm1932_vm2, %v1931_v18, 0.0 }
 0x48a   : > { %1934 = vadd.xlane.f32.xlu0 %v1933_v23 }
 0x517   : > { %v1935_v31 = vpop.xlane.xlu0 %1934 }
 0x518   : > { %v1937_v35 = vadd.f32 %v1936_v29, %v1935_v31 }
 0x51a   : > { %v1948_v41 = vand.u32 2147483647, %v1937_v35  ;;  %v2102_v59 = vmul.f32 -1.442695, %v1937_v35  ;;  %v1945_v56 = vmax.f32 %v1937_v35, 0.0  ;;  %v1946_v45 = vmul.f32 %v1944_v61, %v1937_v35 }
 0x51c   : > { %v1949_v47 = vsub.f32 0.0, %v1948_v41  ;;  %v1947_v15 = vsub.f32 %v1945_v56, %v1946_v45 }
 0x51e   : > { %v1950_v53 = vmul.f32 1.442695, %v1949_v47 }
 0x520   : > { %2883 = vpow2.f32 %v1950_v53 }
 0x521   : > { %2885 = vpow2.f32 %v2102_v59 }
 0x52a   : > { %v2884_v1 = vpop.eup %2883 }
 0x52b   : > { %v1952_v4 = vadd.f32 1.0, %v2884_v1  ;;  %v2886_v10 = vpop.eup %2885  ;;  %v1955_v14 = vmul.f32 -0.5, %v2884_v1  ;;  %v1958_v28 = vand.u32 2147483647, %v2884_v1 }
 0x52c   : > { %v1941_v20 = vadd.f32 1.0, %v2886_v10 }
 0x52d   : > { %2887 = vlog2.f32 %v1952_v4  ;;  %v1956_v21 = vadd.f32 1.0, %v1955_v14  ;;  %vm1959_vm3 = vcmp.lt.f32.partialorder %v1958_v28, 0.0004427343 }
 0x52e   : > { %2889 = vrcp.f32 %v1941_v20 }
 0x52f   : > { %v1957_v36 = vmul.f32 %v2884_v1, %v1956_v21 }
 0x537   : > { %v2888_v40 = vpop.eup %2887 }
 0x538   : > { %v1954_v49 = vmul.f32 0.6931472, %v2888_v40  ;;  %v2890_v44 = vpop.eup %2889 }
 0x53a   : > { %v1960_v25 = vsel %vm1959_vm3, %v1957_v36, %v1954_v49 }
 0x53b   : > { %v1961_v2 = vadd.f32 %v1960_v25, %v1947_v15 }
 0x53d   : > { %1966 = vperm.xlu1 %2830, %v1961_v2  }
 0x541   : > { %1972 = vperm.xlu1 %2830, %v2890_v44  }
 0x5bc   : > { %v1967_v16 = vpop.permute.xlu1 %1966 }
 0x5bd   : > { %v1969_v0 = vsel %vm1963_vm4, %v1967_v16, 0.0 }
 0x5c0   : > { %v1973_v43 = vpop.permute.xlu1 %1972 }
 0x5c1   : > { %v1975_v24 = vsel %vm1962_vm5, %v1973_v43, %v1969_v0 }
 0x5c2   : > { %1976 = vst [vmem:[%s402_s16] sm:$0x1] %v1975_v24 }
 0x5c3 PF: > { %s23_s11 = sadd.s32 1, %s2989_s11  }
 0x5c4   : > { %p20_p5 = scmp.ge.s32.totalorder %s23_s11, 4  }
 0x5c6   :  { %22 = sbr.rel (!%p20_p5) target bundleno = 5 (0x5), region = 105 }
 0x5cd   :  { %1994 = vsyncpa [#allocation6], 1 }
 0x5ce   :  { %1996 = vsyncpa [#allocation6 + $0x1], 1 }
 0x5cf   :  { %1997 = vsyncpa [#allocation8], 1 }

</bundles_post_ra>
